<compile_context>
chip_gen: v5e
topology: v5e:2x2
jax: 0.10.0
libtpu: 0.0.40
codegen_flags: <defaults>
</compile_context>

<pallas_src>
import functools

import jax
import jax.numpy as jnp
from jax import lax
from jax.experimental import pallas as pl
from jax.experimental.pallas import tpu as pltpu


# ----------------------------------------------------------------------------- helpers


def _layer_norm(x, w, b, eps=1e-5):
    # x: (S, C) ; w, b: (1, C).  Matches torch.nn.LayerNorm (biased variance, eps inside sqrt).
    mu = jnp.mean(x, axis=-1, keepdims=True)
    xc = x - mu
    var = jnp.mean(xc * xc, axis=-1, keepdims=True)
    return xc * lax.rsqrt(var + eps) * w + b


def _erf(x):
    # Abramowitz & Stegun 7.1.26 rational approximation (max abs err ~1.5e-7).
    # Used instead of lax.erf to guarantee a clean Mosaic lowering (exp + VPU ops only).
    a1, a2, a3, a4, a5 = 0.254829592, -0.284496736, 1.421413741, -1.453152027, 1.061405429
    p = 0.3275911
    sgn = jnp.where(x >= 0.0, 1.0, -1.0)
    ax = jnp.abs(x)
    t = 1.0 / (1.0 + p * ax)
    poly = ((((a5 * t + a4) * t + a3) * t + a2) * t + a1) * t
    return sgn * (1.0 - poly * jnp.exp(-ax * ax))


def _gelu(x):
    # Exact-erf GELU (PyTorch nn.GELU default), via the polynomial erf above.
    return 0.5 * x * (1.0 + _erf(x * 0.7071067811865476))


# ----------------------------------------------------------------------------- kernel


def _encoder_kernel(p_ref, we_ref, add_ref,
                    ln1w_ref, ln1b_ref, wqkv_ref, wo_ref, bo_ref,
                    ln2w_ref, ln2b_ref, fw1_ref, fb1_ref, fw2_ref, fb2_ref,
                    o_ref, x_scr,
                    *, depth: int, heads: int, head_dim: int, scale: float):
    # One whole forward (embed + all transformer blocks) for one batch element.
    #   p_ref  : (W, P)        patches for this batch element
    #   we_ref : (P, C)        patch-embedding weight (pre-transposed)
    #   add_ref: (S, C)        row0 = cls + pos[0]; rows 1.. = embed_bias + pos[i]
    #   ln*/w*/f* refs carry a leading layer axis (stacked once at param-prep time)
    #   o_ref  : (S, C)        output tokens
    #   x_scr  : (S, C) f32    VMEM scratch holding the running token tensor
    S, C = o_ref.shape
    D = head_dim
    HD = heads * D

    # ---- patch embedding + cls token + positional embedding --------------------------
    # cls row comes straight from the additive operand; only the W real rows hit the MXU.
    x_scr[...] = add_ref[...]
    x_scr[1:, :] += jnp.dot(p_ref[...], we_ref[...], preferred_element_type=jnp.float32)
    x = x_scr[...]

    # ---- transformer blocks (layer loop unrolled; all weights resident in VMEM) ------
    for l in range(depth):
        # PreNorm + multi-head attention + residual
        h = _layer_norm(x, ln1w_ref[l], ln1b_ref[l])
        # fused QKV projection: one MXU push instead of 3*H narrow ones
        qkv = jnp.dot(h, wqkv_ref[l], preferred_element_type=jnp.float32)       # (S, 3*HD)

        attn = jnp.zeros((S, C), jnp.float32)
        for hh in range(heads):  # unrolled so the two heads' MXU/EUP/XLU work interleaves
            q = qkv[:, hh * D:(hh + 1) * D]                                     # (S, D)
            k = qkv[:, HD + hh * D:HD + (hh + 1) * D]                           # (S, D)
            v = qkv[:, 2 * HD + hh * D:2 * HD + (hh + 1) * D]                   # (S, D)
            # q @ k^T without materializing a transpose (NT dot dimension numbers)
            s = lax.dot_general(q, k, (((1,), (1,)), ((), ())),
                                preferred_element_type=jnp.float32) * scale     # (S, S)
            m = jnp.max(s, axis=-1, keepdims=True)
            e = jnp.exp(s - m)
            p = e * pl.reciprocal(jnp.sum(e, axis=-1, keepdims=True), approx=False)
            o = jnp.dot(p, v, preferred_element_type=jnp.float32)               # (S, D)
            # accumulate this head directly through the output projection (concat -> MXU accum)
            attn = attn + jnp.dot(o, wo_ref[l * heads + hh],
                                  preferred_element_type=jnp.float32)           # (S, C)
        # (attention dropout p=0.0 is identity)
        x = x + attn + bo_ref[l]

        # PreNorm + FeedForward (Linear -> GELU -> Linear) + residual
        h2 = _layer_norm(x, ln2w_ref[l], ln2b_ref[l])
        f = _gelu(jnp.dot(h2, fw1_ref[l], preferred_element_type=jnp.float32) + fb1_ref[l])
        x = x + jnp.dot(f, fw2_ref[l], preferred_element_type=jnp.float32) + fb2_ref[l]

    o_ref[...] = x.astype(o_ref.dtype)


# ----------------------------------------------------------------------------- wrappers


def prepare_encoder_params(params, *, heads: int, head_channels: int):
    """One-time re-layout of the PyTorch-style parameters into kernel-friendly,
    layer-stacked arrays.  Hoisted out of the per-forward hot path (feedback item 2)."""
    C = params['embed_w'].shape[0]
    H, D = heads, head_channels
    L = len(params['layers'])

    pos = params['pos'][0].astype(jnp.float32)                                  # (S, C)
    we = jnp.transpose(params['embed_w']).astype(jnp.float32)                   # (P, C)
    cls_row = (params['cls'][0, 0] + pos[0])[None, :]                           # (1, C)
    add = jnp.concatenate([cls_row, pos[1:] + params['embed_b'][None, :]],
                          axis=0).astype(jnp.float32)                           # (S, C)

    def stk(fn):
        return jnp.stack([fn(lp) for lp in params['layers']], axis=0).astype(jnp.float32)

    # TODO(synk): the `project_out = Identity` branch (heads==1 and head_channels==hid_channels)
    # is not exercised by this configuration; only the general Linear output projection is built.
    return {
        'we': we,
        'add': add,
        'ln1w': stk(lambda lp: lp['ln1_w'].reshape(1, C)),
        'ln1b': stk(lambda lp: lp['ln1_b'].reshape(1, C)),
        'wqkv': stk(lambda lp: jnp.transpose(lp['w_qkv'])),                     # (L, C, 3*HD)
        'wo': stk(lambda lp: jnp.transpose(lp['w_out'].reshape(C, H, D), (1, 2, 0))
                  ).reshape(L * H, D, C),                                       # (L*H, D, C)
        'bo': stk(lambda lp: lp['b_out'].reshape(1, C)),
        'ln2w': stk(lambda lp: lp['ln2_w'].reshape(1, C)),
        'ln2b': stk(lambda lp: lp['ln2_b'].reshape(1, C)),
        'fw1': stk(lambda lp: jnp.transpose(lp['f_w1'])),                       # (L, C, M)
        'fb1': stk(lambda lp: lp['f_b1'].reshape(1, -1)),                       # (L, 1, M)
        'fw2': stk(lambda lp: jnp.transpose(lp['f_w2'])),                       # (L, M, C)
        'fb2': stk(lambda lp: lp['f_b2'].reshape(1, C)),
    }


def trans_encoder_forward(x, prepped, *, t_patch_size: int, heads: int, head_channels: int):
    """Full TransEncoder forward as ONE fused Pallas kernel. x: (B, num_electrodes, chunk_size)."""
    B, E, T = x.shape
    W = T // t_patch_size
    P = E * t_patch_size
    S, C = prepped['add'].shape
    depth = prepped['ln1w'].shape[0]
    D = head_channels
    HD = heads * D
    M = prepped['fw1'].shape[-1]
    scale = float(D) ** -0.5

    # einops 'b c (w p) -> b w (c p)'  (pure layout, stays in the wrapper / fused by XLA)
    patches = jnp.transpose(x.reshape(B, E, W, t_patch_size), (0, 2, 1, 3)).reshape(B, W, P)

    def _whole(shape):
        # Constant index_map: weights stay resident in VMEM across grid steps.
        # (pipeline_mode=pl.Buffered(1) would halve their buffering; irrelevant at this size.)
        return pl.BlockSpec(shape, lambda b, _n=len(shape): (0,) * _n)

    kernel = functools.partial(_encoder_kernel, depth=depth, heads=heads,
                               head_dim=D, scale=scale)
    return pl.pallas_call(
        kernel,
        out_shape=jax.ShapeDtypeStruct((B, S, C), x.dtype),
        grid_spec=pltpu.PrefetchScalarGridSpec(
            num_scalar_prefetch=0,
            grid=(B,),
            in_specs=[
                pl.BlockSpec((None, W, P), lambda b: (b, 0, 0)),     # patches (squeezed batch)
                _whole((P, C)),                                      # embed weight
                _whole((S, C)),                                      # cls/pos/bias additive
                _whole((depth, 1, C)), _whole((depth, 1, C)),        # LN1 weight / bias
                _whole((depth, C, 3 * HD)),                          # fused QKV weight
                _whole((depth * heads, D, C)),                       # per-head out-proj weight
                _whole((depth, 1, C)),                               # out-proj bias
                _whole((depth, 1, C)), _whole((depth, 1, C)),        # LN2 weight / bias
                _whole((depth, C, M)), _whole((depth, 1, M)),        # FFN w1, b1
                _whole((depth, M, C)), _whole((depth, 1, C)),        # FFN w2, b2
            ],
            out_specs=pl.BlockSpec((None, S, C), lambda b: (b, 0, 0)),
            scratch_shapes=[pltpu.VMEM((S, C), jnp.float32)],
        ),
        compiler_params=pltpu.CompilerParams(dimension_semantics=("parallel",)),
    )(patches, prepped['we'], prepped['add'],
      prepped['ln1w'], prepped['ln1b'], prepped['wqkv'], prepped['wo'], prepped['bo'],
      prepped['ln2w'], prepped['ln2b'], prepped['fw1'], prepped['fb1'],
      prepped['fw2'], prepped['fb2'])


# ----------------------------------------------------------------------------- reference


def _layer_norm_ref(x, w, b, eps=1e-5):
    mu = jnp.mean(x, axis=-1, keepdims=True)
    var = jnp.mean((x - mu) ** 2, axis=-1, keepdims=True)
    return (x - mu) / jnp.sqrt(var + eps) * w + b


def encoder_reference(x, params, *, t_patch_size: int, heads: int, head_channels: int):
    """Plain-JAX reference matching the PyTorch TransEncoder.forward (dropout p=0)."""
    B, E, T = x.shape
    W = T // t_patch_size
    P = E * t_patch_size
    H, D = heads, head_channels
    scale = float(D) ** -0.5

    patches = jnp.transpose(x.reshape(B, E, W, t_patch_size), (0, 2, 1, 3)).reshape(B, W, P)
    tok = jnp.einsum('bwp,cp->bwc', patches, params['embed_w']) + params['embed_b']
    C = tok.shape[-1]
    cls = jnp.broadcast_to(params['cls'], (B, 1, C))
    tok = jnp.concatenate([cls, tok], axis=1) + params['pos'][:, :W + 1]

    for lp in params['layers']:
        h = _layer_norm_ref(tok, lp['ln1_w'], lp['ln1_b'])
        qkv = jnp.einsum('bnc,oc->bno', h, lp['w_qkv'])
        q, k, v = jnp.split(qkv, 3, axis=-1)
        def split_heads(t):  # 'b n (h d) -> b h n d'
            return jnp.transpose(t.reshape(B, -1, H, D), (0, 2, 1, 3))
        q, k, v = map(split_heads, (q, k, v))
        attn = jax.nn.softmax(jnp.einsum('bhnd,bhmd->bhnm', q, k) * scale, axis=-1)
        o = jnp.einsum('bhnm,bhmd->bhnd', attn, v)
        o = jnp.transpose(o, (0, 2, 1, 3)).reshape(B, -1, H * D)
        tok = tok + jnp.einsum('bni,ci->bnc', o, lp['w_out']) + lp['b_out']

        h2 = _layer_norm_ref(tok, lp['ln2_w'], lp['ln2_b'])
        f = jax.nn.gelu(jnp.einsum('bnc,mc->bnm', h2, lp['f_w1']) + lp['f_b1'],
                        approximate=False)
        tok = tok + jnp.einsum('bnm,cm->bnc', f, lp['f_w2']) + lp['f_b2']
    return tok


# ----------------------------------------------------------------------------- test


if __name__ == "__main__":
    # Small shapes consistent with the module (chunk_size divisible by t_patch_size).
    B = 2
    num_electrodes = 8
    chunk_size = 64
    t_patch_size = 16          # -> 4 patches, patch_channels = 128
    hid_channels = 32          # C
    depth = 2
    heads = 2
    head_channels = 16         # D
    mlp_channels = 64          # M

    P = num_electrodes * t_patch_size
    S = chunk_size // t_patch_size + 1
    HD = heads * head_channels

    key = jax.random.PRNGKey(0)
    ks = jax.random.split(key, 5 + depth)

    def lin(k, shape, s=0.08):
        return jax.random.normal(k, shape, jnp.float32) * s

    x = jax.random.normal(ks[0], (B, num_electrodes, chunk_size), jnp.float32)
    params = {
        'embed_w': lin(ks[1], (hid_channels, P), 0.06),
        'embed_b': lin(ks[2], (hid_channels,), 0.05),
        'cls': lin(ks[3], (1, 1, hid_channels), 0.5),
        'pos': lin(ks[4], (1, S, hid_channels), 0.5),
        'layers': [],
    }
    for d in range(depth):
        lk = jax.random.split(ks[5 + d], 11)
        params['layers'].append({
            'ln1_w': 1.0 + 0.1 * jax.random.normal(lk[0], (hid_channels,), jnp.float32),
            'ln1_b': lin(lk[1], (hid_channels,), 0.05),
            'w_qkv': lin(lk[2], (3 * HD, hid_channels)),
            'w_out': lin(lk[3], (hid_channels, HD)),
            'b_out': lin(lk[4], (hid_channels,), 0.05),
            'ln2_w': 1.0 + 0.1 * jax.random.normal(lk[5], (hid_channels,), jnp.float32),
            'ln2_b': lin(lk[6], (hid_channels,), 0.05),
            'f_w1': lin(lk[7], (mlp_channels, hid_channels)),
            'f_b1': lin(lk[8], (mlp_channels,), 0.05),
            'f_w2': lin(lk[9], (hid_channels, mlp_channels)),
            'f_b2': lin(lk[10], (hid_channels,), 0.05),
        })

    # One-time parameter re-layout (hoisted out of the forward hot path).
    prepped = prepare_encoder_params(params, heads=heads, head_channels=head_channels)

    fwd = jax.jit(functools.partial(trans_encoder_forward, t_patch_size=t_patch_size,
                                    heads=heads, head_channels=head_channels))
    y = jax.block_until_ready(fwd(x, prepped))

    y_ref = encoder_reference(x, params, t_patch_size=t_patch_size,
                              heads=heads, head_channels=head_channels)
    err = float(jnp.max(jnp.abs(y - y_ref)))
    # Tolerance covers the polynomial erf GELU and fp summation-order differences.
    assert err < 1e-3, f"mismatch vs reference: max abs err = {err}"
    print("KERNEL_OK")
</pallas_src>

<mosaic_0001>
module attributes {stable_mosaic.version = 11 : i64} {
  func.func @_encoder_kernel(%arg0: i32, %arg1: memref<1x4x128xf32, #tpu.memory_space<vmem>>, %arg2: memref<128x32xf32, #tpu.memory_space<vmem>>, %arg3: memref<5x32xf32, #tpu.memory_space<vmem>>, %arg4: memref<2x1x32xf32, #tpu.memory_space<vmem>>, %arg5: memref<2x1x32xf32, #tpu.memory_space<vmem>>, %arg6: memref<2x32x96xf32, #tpu.memory_space<vmem>>, %arg7: memref<4x16x32xf32, #tpu.memory_space<vmem>>, %arg8: memref<2x1x32xf32, #tpu.memory_space<vmem>>, %arg9: memref<2x1x32xf32, #tpu.memory_space<vmem>>, %arg10: memref<2x1x32xf32, #tpu.memory_space<vmem>>, %arg11: memref<2x32x64xf32, #tpu.memory_space<vmem>>, %arg12: memref<2x1x64xf32, #tpu.memory_space<vmem>>, %arg13: memref<2x64x32xf32, #tpu.memory_space<vmem>>, %arg14: memref<2x1x32xf32, #tpu.memory_space<vmem>>, %arg15: memref<1x5x32xf32, #tpu.memory_space<vmem>>, %arg16: memref<5x32xf32, #tpu.memory_space<vmem>>) attributes {dimension_semantics = [#tpu.dimension_semantics<parallel>], iteration_bounds = array<i64: 2>, scalar_prefetch = 0 : i64, scratch_operands = 1 : i64, tpu.core_type = #tpu.core_type<tc>, window_params = [{transform_indices = @transform_0, window_bounds = array<i64: 1, 4, 128>}, {pipeline_mode = #tpu.pipeline_mode<synchronous>, transform_indices = @transform_1, window_bounds = array<i64: 128, 32>}, {pipeline_mode = #tpu.pipeline_mode<synchronous>, transform_indices = @transform_2, window_bounds = array<i64: 5, 32>}, {pipeline_mode = #tpu.pipeline_mode<synchronous>, transform_indices = @transform_3, window_bounds = array<i64: 2, 1, 32>}, {pipeline_mode = #tpu.pipeline_mode<synchronous>, transform_indices = @transform_4, window_bounds = array<i64: 2, 1, 32>}, {pipeline_mode = #tpu.pipeline_mode<synchronous>, transform_indices = @transform_5, window_bounds = array<i64: 2, 32, 96>}, {pipeline_mode = #tpu.pipeline_mode<synchronous>, transform_indices = @transform_6, window_bounds = array<i64: 4, 16, 32>}, {pipeline_mode = #tpu.pipeline_mode<synchronous>, transform_indices = @transform_7, window_bounds = array<i64: 2, 1, 32>}, {pipeline_mode = #tpu.pipeline_mode<synchronous>, transform_indices = @transform_8, window_bounds = array<i64: 2, 1, 32>}, {pipeline_mode = #tpu.pipeline_mode<synchronous>, transform_indices = @transform_9, window_bounds = array<i64: 2, 1, 32>}, {pipeline_mode = #tpu.pipeline_mode<synchronous>, transform_indices = @transform_10, window_bounds = array<i64: 2, 32, 64>}, {pipeline_mode = #tpu.pipeline_mode<synchronous>, transform_indices = @transform_11, window_bounds = array<i64: 2, 1, 64>}, {pipeline_mode = #tpu.pipeline_mode<synchronous>, transform_indices = @transform_12, window_bounds = array<i64: 2, 64, 32>}, {pipeline_mode = #tpu.pipeline_mode<synchronous>, transform_indices = @transform_13, window_bounds = array<i64: 2, 1, 32>}, {transform_indices = @transform_14, window_bounds = array<i64: 1, 5, 32>}]} {
    %c0 = arith.constant 0 : index
    %c0_0 = arith.constant 0 : index
    %0 = vector.load %arg3[%c0, %c0_0] : memref<5x32xf32, #tpu.memory_space<vmem>>, vector<5x32xf32>
    %c0_1 = arith.constant 0 : index
    %c0_2 = arith.constant 0 : index
    %1 = vector.load %arg16[%c0_1, %c0_2] : memref<5x32xf32, #tpu.memory_space<vmem>>, vector<5x32xf32>
    tpu.vector_store %arg16[%c0_1, %c0_2], %0 {strides = array<i32>} : memref<5x32xf32, #tpu.memory_space<vmem>>, vector<5x32xf32>,
    %c1 = arith.constant 1 : index
    %c0_3 = arith.constant 0 : index
    %2 = vector.load %arg16[%c1, %c0_3] : memref<5x32xf32, #tpu.memory_space<vmem>>, vector<4x32xf32>
    %c0_4 = arith.constant 0 : index
    %c0_5 = arith.constant 0 : index
    %c0_6 = arith.constant 0 : index
    %3 = vector.load %arg1[%c0_4, %c0_5, %c0_6] : memref<1x4x128xf32, #tpu.memory_space<vmem>>, vector<1x4x128xf32>
    %4 = vector.shape_cast %3 : vector<1x4x128xf32> to vector<4x128xf32>
    %c0_7 = arith.constant 0 : index
    %c0_8 = arith.constant 0 : index
    %5 = vector.load %arg2[%c0_7, %c0_8] : memref<128x32xf32, #tpu.memory_space<vmem>>, vector<128x32xf32>
    %cst = arith.constant dense<0.000000e+00> : vector<4x32xf32>
    %6 = tpu.matmul %4, %5, %cst {dimension_numbers = #tpu.dot_dimension_numbers<[1], [0], [0], [1], [0, 0, 1, 1], [], []>} : vector<4x128xf32>, vector<128x32xf32>, vector<4x32xf32> -> vector<4x32xf32>
    %7 = arith.addf %2, %6 : vector<4x32xf32>
    %c1_9 = arith.constant 1 : index
    %c0_10 = arith.constant 0 : index
    %8 = vector.load %arg16[%c1_9, %c0_10] : memref<5x32xf32, #tpu.memory_space<vmem>>, vector<4x32xf32>
    tpu.vector_store %arg16[%c1_9, %c0_10], %7 {strides = array<i32>} : memref<5x32xf32, #tpu.memory_space<vmem>>, vector<4x32xf32>,
    %c0_11 = arith.constant 0 : index
    %c0_12 = arith.constant 0 : index
    %9 = vector.load %arg16[%c0_11, %c0_12] : memref<5x32xf32, #tpu.memory_space<vmem>>, vector<5x32xf32>
    %c0_13 = arith.constant 0 : index
    %c0_14 = arith.constant 0 : index
    %c0_15 = arith.constant 0 : index
    %10 = vector.load %arg4[%c0_13, %c0_14, %c0_15] : memref<2x1x32xf32, #tpu.memory_space<vmem>>, vector<1x1x32xf32>
    %11 = vector.shape_cast %10 : vector<1x1x32xf32> to vector<1x32xf32>
    %c0_16 = arith.constant 0 : index
    %c0_17 = arith.constant 0 : index
    %c0_18 = arith.constant 0 : index
    %12 = vector.load %arg5[%c0_16, %c0_17, %c0_18] : memref<2x1x32xf32, #tpu.memory_space<vmem>>, vector<1x1x32xf32>
    %13 = vector.shape_cast %12 : vector<1x1x32xf32> to vector<1x32xf32>
    %cst_19 = arith.constant dense<0.000000e+00> : vector<5xf32>
    %14 = vector.multi_reduction <add>, %9, %cst_19 [1] : vector<5x32xf32> to vector<5xf32>
    %15 = vector.shape_cast %14 : vector<5xf32> to vector<5x1xf32>
    %cst_20 = arith.constant 3.200000e+01 : f32
    %16 = vector.broadcast %cst_20 : f32 to vector<5x1xf32>
    %17 = arith.divf %15, %16 : vector<5x1xf32>
    %18 = vector.broadcast %17 : vector<5x1xf32> to vector<5x32xf32>
    %19 = arith.subf %9, %18 : vector<5x32xf32>
    %20 = arith.mulf %19, %19 : vector<5x32xf32>
    %cst_21 = arith.constant dense<0.000000e+00> : vector<5xf32>
    %21 = vector.multi_reduction <add>, %20, %cst_21 [1] : vector<5x32xf32> to vector<5xf32>
    %22 = vector.shape_cast %21 : vector<5xf32> to vector<5x1xf32>
    %cst_22 = arith.constant 3.200000e+01 : f32
    %23 = vector.broadcast %cst_22 : f32 to vector<5x1xf32>
    %24 = arith.divf %22, %23 : vector<5x1xf32>
    %cst_23 = arith.constant 9.99999974E-6 : f32
    %25 = vector.broadcast %cst_23 : f32 to vector<5x1xf32>
    %26 = arith.addf %24, %25 : vector<5x1xf32>
    %27 = math.rsqrt %26 : vector<5x1xf32>
    %28 = vector.broadcast %27 : vector<5x1xf32> to vector<5x32xf32>
    %29 = arith.mulf %19, %28 : vector<5x32xf32>
    %30 = vector.broadcast %11 : vector<1x32xf32> to vector<5x32xf32>
    %31 = arith.mulf %29, %30 : vector<5x32xf32>
    %32 = vector.broadcast %13 : vector<1x32xf32> to vector<5x32xf32>
    %33 = arith.addf %31, %32 : vector<5x32xf32>
    %c0_24 = arith.constant 0 : index
    %c0_25 = arith.constant 0 : index
    %c0_26 = arith.constant 0 : index
    %34 = vector.load %arg6[%c0_24, %c0_25, %c0_26] : memref<2x32x96xf32, #tpu.memory_space<vmem>>, vector<1x32x96xf32>
    %35 = vector.shape_cast %34 : vector<1x32x96xf32> to vector<32x96xf32>
    %cst_27 = arith.constant dense<0.000000e+00> : vector<5x96xf32>
    %36 = tpu.matmul %33, %35, %cst_27 {dimension_numbers = #tpu.dot_dimension_numbers<[1], [0], [0], [1], [0, 0, 1, 1], [], []>} : vector<5x32xf32>, vector<32x96xf32>, vector<5x96xf32> -> vector<5x96xf32>
    %cst_28 = arith.constant 0.000000e+00 : f32
    %37 = vector.broadcast %cst_28 : f32 to vector<5x32xf32>
    %38 = vector.extract_strided_slice %36 {offsets = [0, 0], sizes = [5, 16], strides = [1, 1]} : vector<5x96xf32> to vector<5x16xf32>
    %39 = vector.extract_strided_slice %36 {offsets = [0, 32], sizes = [5, 16], strides = [1, 1]} : vector<5x96xf32> to vector<5x16xf32>
    %40 = vector.extract_strided_slice %36 {offsets = [0, 64], sizes = [5, 16], strides = [1, 1]} : vector<5x96xf32> to vector<5x16xf32>
    %cst_29 = arith.constant dense<0.000000e+00> : vector<5x5xf32>
    %41 = tpu.matmul %38, %39, %cst_29 {dimension_numbers = #tpu.dot_dimension_numbers<[1], [1], [0], [0], [0, 0, 1, 0], [], []>} : vector<5x16xf32>, vector<5x16xf32>, vector<5x5xf32> -> vector<5x5xf32>
    %cst_30 = arith.constant 2.500000e-01 : f32
    %42 = vector.broadcast %cst_30 : f32 to vector<5x5xf32>
    %43 = arith.mulf %41, %42 : vector<5x5xf32>
    %cst_31 = arith.constant dense<0xFF800000> : vector<5xf32>
    %44 = vector.multi_reduction <maximumf>, %43, %cst_31 [1] : vector<5x5xf32> to vector<5xf32>
    %45 = vector.shape_cast %44 : vector<5xf32> to vector<5x1xf32>
    %46 = vector.broadcast %45 : vector<5x1xf32> to vector<5x5xf32>
    %47 = arith.subf %43, %46 : vector<5x5xf32>
    %48 = math.exp %47 : vector<5x5xf32>
    %cst_32 = arith.constant dense<0.000000e+00> : vector<5xf32>
    %49 = vector.multi_reduction <add>, %48, %cst_32 [1] : vector<5x5xf32> to vector<5xf32>
    %50 = vector.shape_cast %49 : vector<5xf32> to vector<5x1xf32>
    %51 = tpu.reciprocal %50 : vector<5x1xf32> -> vector<5x1xf32>
    %52 = vector.broadcast %51 : vector<5x1xf32> to vector<5x5xf32>
    %53 = arith.mulf %48, %52 : vector<5x5xf32>
    %cst_33 = arith.constant dense<0.000000e+00> : vector<5x16xf32>
    %54 = tpu.matmul %53, %40, %cst_33 {dimension_numbers = #tpu.dot_dimension_numbers<[1], [0], [0], [1], [0, 0, 1, 1], [], []>} : vector<5x5xf32>, vector<5x16xf32>, vector<5x16xf32> -> vector<5x16xf32>
    %c0_34 = arith.constant 0 : index
    %c0_35 = arith.constant 0 : index
    %c0_36 = arith.constant 0 : index
    %55 = vector.load %arg7[%c0_34, %c0_35, %c0_36] : memref<4x16x32xf32, #tpu.memory_space<vmem>>, vector<1x16x32xf32>
    %56 = vector.shape_cast %55 : vector<1x16x32xf32> to vector<16x32xf32>
    %cst_37 = arith.constant dense<0.000000e+00> : vector<5x32xf32>
    %57 = tpu.matmul %54, %56, %cst_37 {dimension_numbers = #tpu.dot_dimension_numbers<[1], [0], [0], [1], [0, 0, 1, 1], [], []>} : vector<5x16xf32>, vector<16x32xf32>, vector<5x32xf32> -> vector<5x32xf32>
    %58 = arith.addf %37, %57 : vector<5x32xf32>
    %59 = vector.extract_strided_slice %36 {offsets = [0, 16], sizes = [5, 16], strides = [1, 1]} : vector<5x96xf32> to vector<5x16xf32>
    %60 = vector.extract_strided_slice %36 {offsets = [0, 48], sizes = [5, 16], strides = [1, 1]} : vector<5x96xf32> to vector<5x16xf32>
    %61 = vector.extract_strided_slice %36 {offsets = [0, 80], sizes = [5, 16], strides = [1, 1]} : vector<5x96xf32> to vector<5x16xf32>
    %cst_38 = arith.constant dense<0.000000e+00> : vector<5x5xf32>
    %62 = tpu.matmul %59, %60, %cst_38 {dimension_numbers = #tpu.dot_dimension_numbers<[1], [1], [0], [0], [0, 0, 1, 0], [], []>} : vector<5x16xf32>, vector<5x16xf32>, vector<5x5xf32> -> vector<5x5xf32>
    %cst_39 = arith.constant 2.500000e-01 : f32
    %63 = vector.broadcast %cst_39 : f32 to vector<5x5xf32>
    %64 = arith.mulf %62, %63 : vector<5x5xf32>
    %cst_40 = arith.constant dense<0xFF800000> : vector<5xf32>
    %65 = vector.multi_reduction <maximumf>, %64, %cst_40 [1] : vector<5x5xf32> to vector<5xf32>
    %66 = vector.shape_cast %65 : vector<5xf32> to vector<5x1xf32>
    %67 = vector.broadcast %66 : vector<5x1xf32> to vector<5x5xf32>
    %68 = arith.subf %64, %67 : vector<5x5xf32>
    %69 = math.exp %68 : vector<5x5xf32>
    %cst_41 = arith.constant dense<0.000000e+00> : vector<5xf32>
    %70 = vector.multi_reduction <add>, %69, %cst_41 [1] : vector<5x5xf32> to vector<5xf32>
    %71 = vector.shape_cast %70 : vector<5xf32> to vector<5x1xf32>
    %72 = tpu.reciprocal %71 : vector<5x1xf32> -> vector<5x1xf32>
    %73 = vector.broadcast %72 : vector<5x1xf32> to vector<5x5xf32>
    %74 = arith.mulf %69, %73 : vector<5x5xf32>
    %cst_42 = arith.constant dense<0.000000e+00> : vector<5x16xf32>
    %75 = tpu.matmul %74, %61, %cst_42 {dimension_numbers = #tpu.dot_dimension_numbers<[1], [0], [0], [1], [0, 0, 1, 1], [], []>} : vector<5x5xf32>, vector<5x16xf32>, vector<5x16xf32> -> vector<5x16xf32>
    %c1_43 = arith.constant 1 : index
    %c0_44 = arith.constant 0 : index
    %c0_45 = arith.constant 0 : index
    %76 = vector.load %arg7[%c1_43, %c0_44, %c0_45] : memref<4x16x32xf32, #tpu.memory_space<vmem>>, vector<1x16x32xf32>
    %77 = vector.shape_cast %76 : vector<1x16x32xf32> to vector<16x32xf32>
    %cst_46 = arith.constant dense<0.000000e+00> : vector<5x32xf32>
    %78 = tpu.matmul %75, %77, %cst_46 {dimension_numbers = #tpu.dot_dimension_numbers<[1], [0], [0], [1], [0, 0, 1, 1], [], []>} : vector<5x16xf32>, vector<16x32xf32>, vector<5x32xf32> -> vector<5x32xf32>
    %79 = arith.addf %58, %78 : vector<5x32xf32>
    %80 = arith.addf %9, %79 : vector<5x32xf32>
    %c0_47 = arith.constant 0 : index
    %c0_48 = arith.constant 0 : index
    %c0_49 = arith.constant 0 : index
    %81 = vector.load %arg8[%c0_47, %c0_48, %c0_49] : memref<2x1x32xf32, #tpu.memory_space<vmem>>, vector<1x1x32xf32>
    %82 = vector.shape_cast %81 : vector<1x1x32xf32> to vector<1x32xf32>
    %83 = vector.broadcast %82 : vector<1x32xf32> to vector<5x32xf32>
    %84 = arith.addf %80, %83 : vector<5x32xf32>
    %c0_50 = arith.constant 0 : index
    %c0_51 = arith.constant 0 : index
    %c0_52 = arith.constant 0 : index
    %85 = vector.load %arg9[%c0_50, %c0_51, %c0_52] : memref<2x1x32xf32, #tpu.memory_space<vmem>>, vector<1x1x32xf32>
    %86 = vector.shape_cast %85 : vector<1x1x32xf32> to vector<1x32xf32>
    %c0_53 = arith.constant 0 : index
    %c0_54 = arith.constant 0 : index
    %c0_55 = arith.constant 0 : index
    %87 = vector.load %arg10[%c0_53, %c0_54, %c0_55] : memref<2x1x32xf32, #tpu.memory_space<vmem>>, vector<1x1x32xf32>
    %88 = vector.shape_cast %87 : vector<1x1x32xf32> to vector<1x32xf32>
    %cst_56 = arith.constant dense<0.000000e+00> : vector<5xf32>
    %89 = vector.multi_reduction <add>, %84, %cst_56 [1] : vector<5x32xf32> to vector<5xf32>
    %90 = vector.shape_cast %89 : vector<5xf32> to vector<5x1xf32>
    %cst_57 = arith.constant 3.200000e+01 : f32
    %91 = vector.broadcast %cst_57 : f32 to vector<5x1xf32>
    %92 = arith.divf %90, %91 : vector<5x1xf32>
    %93 = vector.broadcast %92 : vector<5x1xf32> to vector<5x32xf32>
    %94 = arith.subf %84, %93 : vector<5x32xf32>
    %95 = arith.mulf %94, %94 : vector<5x32xf32>
    %cst_58 = arith.constant dense<0.000000e+00> : vector<5xf32>
    %96 = vector.multi_reduction <add>, %95, %cst_58 [1] : vector<5x32xf32> to vector<5xf32>
    %97 = vector.shape_cast %96 : vector<5xf32> to vector<5x1xf32>
    %cst_59 = arith.constant 3.200000e+01 : f32
    %98 = vector.broadcast %cst_59 : f32 to vector<5x1xf32>
    %99 = arith.divf %97, %98 : vector<5x1xf32>
    %cst_60 = arith.constant 9.99999974E-6 : f32
    %100 = vector.broadcast %cst_60 : f32 to vector<5x1xf32>
    %101 = arith.addf %99, %100 : vector<5x1xf32>
    %102 = math.rsqrt %101 : vector<5x1xf32>
    %103 = vector.broadcast %102 : vector<5x1xf32> to vector<5x32xf32>
    %104 = arith.mulf %94, %103 : vector<5x32xf32>
    %105 = vector.broadcast %86 : vector<1x32xf32> to vector<5x32xf32>
    %106 = arith.mulf %104, %105 : vector<5x32xf32>
    %107 = vector.broadcast %88 : vector<1x32xf32> to vector<5x32xf32>
    %108 = arith.addf %106, %107 : vector<5x32xf32>
    %c0_61 = arith.constant 0 : index
    %c0_62 = arith.constant 0 : index
    %c0_63 = arith.constant 0 : index
    %109 = vector.load %arg11[%c0_61, %c0_62, %c0_63] : memref<2x32x64xf32, #tpu.memory_space<vmem>>, vector<1x32x64xf32>
    %110 = vector.shape_cast %109 : vector<1x32x64xf32> to vector<32x64xf32>
    %cst_64 = arith.constant dense<0.000000e+00> : vector<5x64xf32>
    %111 = tpu.matmul %108, %110, %cst_64 {dimension_numbers = #tpu.dot_dimension_numbers<[1], [0], [0], [1], [0, 0, 1, 1], [], []>} : vector<5x32xf32>, vector<32x64xf32>, vector<5x64xf32> -> vector<5x64xf32>
    %c0_65 = arith.constant 0 : index
    %c0_66 = arith.constant 0 : index
    %c0_67 = arith.constant 0 : index
    %112 = vector.load %arg12[%c0_65, %c0_66, %c0_67] : memref<2x1x64xf32, #tpu.memory_space<vmem>>, vector<1x1x64xf32>
    %113 = vector.shape_cast %112 : vector<1x1x64xf32> to vector<1x64xf32>
    %114 = vector.broadcast %113 : vector<1x64xf32> to vector<5x64xf32>
    %115 = arith.addf %111, %114 : vector<5x64xf32>
    %cst_68 = arith.constant 5.000000e-01 : f32
    %116 = vector.broadcast %cst_68 : f32 to vector<5x64xf32>
    %117 = arith.mulf %116, %115 : vector<5x64xf32>
    %cst_69 = arith.constant 0.707106769 : f32
    %118 = vector.broadcast %cst_69 : f32 to vector<5x64xf32>
    %119 = arith.mulf %115, %118 : vector<5x64xf32>
    %cst_70 = arith.constant 0.000000e+00 : f32
    %120 = vector.broadcast %cst_70 : f32 to vector<5x64xf32>
    %121 = arith.cmpf oge, %119, %120 : vector<5x64xf32>
    %cst_71 = arith.constant 1.000000e+00 : f32
    %cst_72 = arith.constant -1.000000e+00 : f32
    %122 = vector.broadcast %cst_71 : f32 to vector<5x64xf32>
    %123 = vector.broadcast %cst_72 : f32 to vector<5x64xf32>
    %124 = arith.select %121, %122, %123 : vector<5x64xi1>, vector<5x64xf32>
    %125 = math.absf %119 : vector<5x64xf32>
    %cst_73 = arith.constant 0.327591091 : f32
    %126 = vector.broadcast %cst_73 : f32 to vector<5x64xf32>
    %127 = arith.mulf %126, %125 : vector<5x64xf32>
    %cst_74 = arith.constant 1.000000e+00 : f32
    %128 = vector.broadcast %cst_74 : f32 to vector<5x64xf32>
    %129 = arith.addf %128, %127 : vector<5x64xf32>
    %cst_75 = arith.constant 1.000000e+00 : f32
    %130 = vector.broadcast %cst_75 : f32 to vector<5x64xf32>
    %131 = arith.divf %130, %129 : vector<5x64xf32>
    %cst_76 = arith.constant 1.06140542 : f32
    %132 = vector.broadcast %cst_76 : f32 to vector<5x64xf32>
    %133 = arith.mulf %132, %131 : vector<5x64xf32>
    %cst_77 = arith.constant -1.45315206 : f32
    %134 = vector.broadcast %cst_77 : f32 to vector<5x64xf32>
    %135 = arith.addf %133, %134 : vector<5x64xf32>
    %136 = arith.mulf %135, %131 : vector<5x64xf32>
    %cst_78 = arith.constant 1.42141378 : f32
    %137 = vector.broadcast %cst_78 : f32 to vector<5x64xf32>
    %138 = arith.addf %136, %137 : vector<5x64xf32>
    %139 = arith.mulf %138, %131 : vector<5x64xf32>
    %cst_79 = arith.constant -0.284496725 : f32
    %140 = vector.broadcast %cst_79 : f32 to vector<5x64xf32>
    %141 = arith.addf %139, %140 : vector<5x64xf32>
    %142 = arith.mulf %141, %131 : vector<5x64xf32>
    %cst_80 = arith.constant 0.254829586 : f32
    %143 = vector.broadcast %cst_80 : f32 to vector<5x64xf32>
    %144 = arith.addf %142, %143 : vector<5x64xf32>
    %145 = arith.mulf %144, %131 : vector<5x64xf32>
    %cst_81 = arith.constant 0.000000e+00 : f32
    %146 = vector.broadcast %cst_81 : f32 to vector<5x64xf32>
    %147 = arith.subf %146, %125 : vector<5x64xf32>
    %148 = arith.mulf %147, %125 : vector<5x64xf32>
    %149 = math.exp %148 : vector<5x64xf32>
    %150 = arith.mulf %145, %149 : vector<5x64xf32>
    %cst_82 = arith.constant 1.000000e+00 : f32
    %151 = vector.broadcast %cst_82 : f32 to vector<5x64xf32>
    %152 = arith.subf %151, %150 : vector<5x64xf32>
    %153 = arith.mulf %124, %152 : vector<5x64xf32>
    %cst_83 = arith.constant 1.000000e+00 : f32
    %154 = vector.broadcast %cst_83 : f32 to vector<5x64xf32>
    %155 = arith.addf %154, %153 : vector<5x64xf32>
    %156 = arith.mulf %117, %155 : vector<5x64xf32>
    %c0_84 = arith.constant 0 : index
    %c0_85 = arith.constant 0 : index
    %c0_86 = arith.constant 0 : index
    %157 = vector.load %arg13[%c0_84, %c0_85, %c0_86] : memref<2x64x32xf32, #tpu.memory_space<vmem>>, vector<1x64x32xf32>
    %158 = vector.shape_cast %157 : vector<1x64x32xf32> to vector<64x32xf32>
    %cst_87 = arith.constant dense<0.000000e+00> : vector<5x32xf32>
    %159 = tpu.matmul %156, %158, %cst_87 {dimension_numbers = #tpu.dot_dimension_numbers<[1], [0], [0], [1], [0, 0, 1, 1], [], []>} : vector<5x64xf32>, vector<64x32xf32>, vector<5x32xf32> -> vector<5x32xf32>
    %160 = arith.addf %84, %159 : vector<5x32xf32>
    %c0_88 = arith.constant 0 : index
    %c0_89 = arith.constant 0 : index
    %c0_90 = arith.constant 0 : index
    %161 = vector.load %arg14[%c0_88, %c0_89, %c0_90] : memref<2x1x32xf32, #tpu.memory_space<vmem>>, vector<1x1x32xf32>
    %162 = vector.shape_cast %161 : vector<1x1x32xf32> to vector<1x32xf32>
    %163 = vector.broadcast %162 : vector<1x32xf32> to vector<5x32xf32>
    %164 = arith.addf %160, %163 : vector<5x32xf32>
    %c1_91 = arith.constant 1 : index
    %c0_92 = arith.constant 0 : index
    %c0_93 = arith.constant 0 : index
    %165 = vector.load %arg4[%c1_91, %c0_92, %c0_93] : memref<2x1x32xf32, #tpu.memory_space<vmem>>, vector<1x1x32xf32>
    %166 = vector.shape_cast %165 : vector<1x1x32xf32> to vector<1x32xf32>
    %c1_94 = arith.constant 1 : index
    %c0_95 = arith.constant 0 : index
    %c0_96 = arith.constant 0 : index
    %167 = vector.load %arg5[%c1_94, %c0_95, %c0_96] : memref<2x1x32xf32, #tpu.memory_space<vmem>>, vector<1x1x32xf32>
    %168 = vector.shape_cast %167 : vector<1x1x32xf32> to vector<1x32xf32>
    %cst_97 = arith.constant dense<0.000000e+00> : vector<5xf32>
    %169 = vector.multi_reduction <add>, %164, %cst_97 [1] : vector<5x32xf32> to vector<5xf32>
    %170 = vector.shape_cast %169 : vector<5xf32> to vector<5x1xf32>
    %cst_98 = arith.constant 3.200000e+01 : f32
    %171 = vector.broadcast %cst_98 : f32 to vector<5x1xf32>
    %172 = arith.divf %170, %171 : vector<5x1xf32>
    %173 = vector.broadcast %172 : vector<5x1xf32> to vector<5x32xf32>
    %174 = arith.subf %164, %173 : vector<5x32xf32>
    %175 = arith.mulf %174, %174 : vector<5x32xf32>
    %cst_99 = arith.constant dense<0.000000e+00> : vector<5xf32>
    %176 = vector.multi_reduction <add>, %175, %cst_99 [1] : vector<5x32xf32> to vector<5xf32>
    %177 = vector.shape_cast %176 : vector<5xf32> to vector<5x1xf32>
    %cst_100 = arith.constant 3.200000e+01 : f32
    %178 = vector.broadcast %cst_100 : f32 to vector<5x1xf32>
    %179 = arith.divf %177, %178 : vector<5x1xf32>
    %cst_101 = arith.constant 9.99999974E-6 : f32
    %180 = vector.broadcast %cst_101 : f32 to vector<5x1xf32>
    %181 = arith.addf %179, %180 : vector<5x1xf32>
    %182 = math.rsqrt %181 : vector<5x1xf32>
    %183 = vector.broadcast %182 : vector<5x1xf32> to vector<5x32xf32>
    %184 = arith.mulf %174, %183 : vector<5x32xf32>
    %185 = vector.broadcast %166 : vector<1x32xf32> to vector<5x32xf32>
    %186 = arith.mulf %184, %185 : vector<5x32xf32>
    %187 = vector.broadcast %168 : vector<1x32xf32> to vector<5x32xf32>
    %188 = arith.addf %186, %187 : vector<5x32xf32>
    %c1_102 = arith.constant 1 : index
    %c0_103 = arith.constant 0 : index
    %c0_104 = arith.constant 0 : index
    %189 = vector.load %arg6[%c1_102, %c0_103, %c0_104] : memref<2x32x96xf32, #tpu.memory_space<vmem>>, vector<1x32x96xf32>
    %190 = vector.shape_cast %189 : vector<1x32x96xf32> to vector<32x96xf32>
    %cst_105 = arith.constant dense<0.000000e+00> : vector<5x96xf32>
    %191 = tpu.matmul %188, %190, %cst_105 {dimension_numbers = #tpu.dot_dimension_numbers<[1], [0], [0], [1], [0, 0, 1, 1], [], []>} : vector<5x32xf32>, vector<32x96xf32>, vector<5x96xf32> -> vector<5x96xf32>
    %cst_106 = arith.constant 0.000000e+00 : f32
    %192 = vector.broadcast %cst_106 : f32 to vector<5x32xf32>
    %193 = vector.extract_strided_slice %191 {offsets = [0, 0], sizes = [5, 16], strides = [1, 1]} : vector<5x96xf32> to vector<5x16xf32>
    %194 = vector.extract_strided_slice %191 {offsets = [0, 32], sizes = [5, 16], strides = [1, 1]} : vector<5x96xf32> to vector<5x16xf32>
    %195 = vector.extract_strided_slice %191 {offsets = [0, 64], sizes = [5, 16], strides = [1, 1]} : vector<5x96xf32> to vector<5x16xf32>
    %cst_107 = arith.constant dense<0.000000e+00> : vector<5x5xf32>
    %196 = tpu.matmul %193, %194, %cst_107 {dimension_numbers = #tpu.dot_dimension_numbers<[1], [1], [0], [0], [0, 0, 1, 0], [], []>} : vector<5x16xf32>, vector<5x16xf32>, vector<5x5xf32> -> vector<5x5xf32>
    %cst_108 = arith.constant 2.500000e-01 : f32
    %197 = vector.broadcast %cst_108 : f32 to vector<5x5xf32>
    %198 = arith.mulf %196, %197 : vector<5x5xf32>
    %cst_109 = arith.constant dense<0xFF800000> : vector<5xf32>
    %199 = vector.multi_reduction <maximumf>, %198, %cst_109 [1] : vector<5x5xf32> to vector<5xf32>
    %200 = vector.shape_cast %199 : vector<5xf32> to vector<5x1xf32>
    %201 = vector.broadcast %200 : vector<5x1xf32> to vector<5x5xf32>
    %202 = arith.subf %198, %201 : vector<5x5xf32>
    %203 = math.exp %202 : vector<5x5xf32>
    %cst_110 = arith.constant dense<0.000000e+00> : vector<5xf32>
    %204 = vector.multi_reduction <add>, %203, %cst_110 [1] : vector<5x5xf32> to vector<5xf32>
    %205 = vector.shape_cast %204 : vector<5xf32> to vector<5x1xf32>
    %206 = tpu.reciprocal %205 : vector<5x1xf32> -> vector<5x1xf32>
    %207 = vector.broadcast %206 : vector<5x1xf32> to vector<5x5xf32>
    %208 = arith.mulf %203, %207 : vector<5x5xf32>
    %cst_111 = arith.constant dense<0.000000e+00> : vector<5x16xf32>
    %209 = tpu.matmul %208, %195, %cst_111 {dimension_numbers = #tpu.dot_dimension_numbers<[1], [0], [0], [1], [0, 0, 1, 1], [], []>} : vector<5x5xf32>, vector<5x16xf32>, vector<5x16xf32> -> vector<5x16xf32>
    %c2 = arith.constant 2 : index
    %c0_112 = arith.constant 0 : index
    %c0_113 = arith.constant 0 : index
    %210 = vector.load %arg7[%c2, %c0_112, %c0_113] : memref<4x16x32xf32, #tpu.memory_space<vmem>>, vector<1x16x32xf32>
    %211 = vector.shape_cast %210 : vector<1x16x32xf32> to vector<16x32xf32>
    %cst_114 = arith.constant dense<0.000000e+00> : vector<5x32xf32>
    %212 = tpu.matmul %209, %211, %cst_114 {dimension_numbers = #tpu.dot_dimension_numbers<[1], [0], [0], [1], [0, 0, 1, 1], [], []>} : vector<5x16xf32>, vector<16x32xf32>, vector<5x32xf32> -> vector<5x32xf32>
    %213 = arith.addf %192, %212 : vector<5x32xf32>
    %214 = vector.extract_strided_slice %191 {offsets = [0, 16], sizes = [5, 16], strides = [1, 1]} : vector<5x96xf32> to vector<5x16xf32>
    %215 = vector.extract_strided_slice %191 {offsets = [0, 48], sizes = [5, 16], strides = [1, 1]} : vector<5x96xf32> to vector<5x16xf32>
    %216 = vector.extract_strided_slice %191 {offsets = [0, 80], sizes = [5, 16], strides = [1, 1]} : vector<5x96xf32> to vector<5x16xf32>
    %cst_115 = arith.constant dense<0.000000e+00> : vector<5x5xf32>
    %217 = tpu.matmul %214, %215, %cst_115 {dimension_numbers = #tpu.dot_dimension_numbers<[1], [1], [0], [0], [0, 0, 1, 0], [], []>} : vector<5x16xf32>, vector<5x16xf32>, vector<5x5xf32> -> vector<5x5xf32>
    %cst_116 = arith.constant 2.500000e-01 : f32
    %218 = vector.broadcast %cst_116 : f32 to vector<5x5xf32>
    %219 = arith.mulf %217, %218 : vector<5x5xf32>
    %cst_117 = arith.constant dense<0xFF800000> : vector<5xf32>
    %220 = vector.multi_reduction <maximumf>, %219, %cst_117 [1] : vector<5x5xf32> to vector<5xf32>
    %221 = vector.shape_cast %220 : vector<5xf32> to vector<5x1xf32>
    %222 = vector.broadcast %221 : vector<5x1xf32> to vector<5x5xf32>
    %223 = arith.subf %219, %222 : vector<5x5xf32>
    %224 = math.exp %223 : vector<5x5xf32>
    %cst_118 = arith.constant dense<0.000000e+00> : vector<5xf32>
    %225 = vector.multi_reduction <add>, %224, %cst_118 [1] : vector<5x5xf32> to vector<5xf32>
    %226 = vector.shape_cast %225 : vector<5xf32> to vector<5x1xf32>
    %227 = tpu.reciprocal %226 : vector<5x1xf32> -> vector<5x1xf32>
    %228 = vector.broadcast %227 : vector<5x1xf32> to vector<5x5xf32>
    %229 = arith.mulf %224, %228 : vector<5x5xf32>
    %cst_119 = arith.constant dense<0.000000e+00> : vector<5x16xf32>
    %230 = tpu.matmul %229, %216, %cst_119 {dimension_numbers = #tpu.dot_dimension_numbers<[1], [0], [0], [1], [0, 0, 1, 1], [], []>} : vector<5x5xf32>, vector<5x16xf32>, vector<5x16xf32> -> vector<5x16xf32>
    %c3 = arith.constant 3 : index
    %c0_120 = arith.constant 0 : index
    %c0_121 = arith.constant 0 : index
    %231 = vector.load %arg7[%c3, %c0_120, %c0_121] : memref<4x16x32xf32, #tpu.memory_space<vmem>>, vector<1x16x32xf32>
    %232 = vector.shape_cast %231 : vector<1x16x32xf32> to vector<16x32xf32>
    %cst_122 = arith.constant dense<0.000000e+00> : vector<5x32xf32>
    %233 = tpu.matmul %230, %232, %cst_122 {dimension_numbers = #tpu.dot_dimension_numbers<[1], [0], [0], [1], [0, 0, 1, 1], [], []>} : vector<5x16xf32>, vector<16x32xf32>, vector<5x32xf32> -> vector<5x32xf32>
    %234 = arith.addf %213, %233 : vector<5x32xf32>
    %235 = arith.addf %164, %234 : vector<5x32xf32>
    %c1_123 = arith.constant 1 : index
    %c0_124 = arith.constant 0 : index
    %c0_125 = arith.constant 0 : index
    %236 = vector.load %arg8[%c1_123, %c0_124, %c0_125] : memref<2x1x32xf32, #tpu.memory_space<vmem>>, vector<1x1x32xf32>
    %237 = vector.shape_cast %236 : vector<1x1x32xf32> to vector<1x32xf32>
    %238 = vector.broadcast %237 : vector<1x32xf32> to vector<5x32xf32>
    %239 = arith.addf %235, %238 : vector<5x32xf32>
    %c1_126 = arith.constant 1 : index
    %c0_127 = arith.constant 0 : index
    %c0_128 = arith.constant 0 : index
    %240 = vector.load %arg9[%c1_126, %c0_127, %c0_128] : memref<2x1x32xf32, #tpu.memory_space<vmem>>, vector<1x1x32xf32>
    %241 = vector.shape_cast %240 : vector<1x1x32xf32> to vector<1x32xf32>
    %c1_129 = arith.constant 1 : index
    %c0_130 = arith.constant 0 : index
    %c0_131 = arith.constant 0 : index
    %242 = vector.load %arg10[%c1_129, %c0_130, %c0_131] : memref<2x1x32xf32, #tpu.memory_space<vmem>>, vector<1x1x32xf32>
    %243 = vector.shape_cast %242 : vector<1x1x32xf32> to vector<1x32xf32>
    %cst_132 = arith.constant dense<0.000000e+00> : vector<5xf32>
    %244 = vector.multi_reduction <add>, %239, %cst_132 [1] : vector<5x32xf32> to vector<5xf32>
    %245 = vector.shape_cast %244 : vector<5xf32> to vector<5x1xf32>
    %cst_133 = arith.constant 3.200000e+01 : f32
    %246 = vector.broadcast %cst_133 : f32 to vector<5x1xf32>
    %247 = arith.divf %245, %246 : vector<5x1xf32>
    %248 = vector.broadcast %247 : vector<5x1xf32> to vector<5x32xf32>
    %249 = arith.subf %239, %248 : vector<5x32xf32>
    %250 = arith.mulf %249, %249 : vector<5x32xf32>
    %cst_134 = arith.constant dense<0.000000e+00> : vector<5xf32>
    %251 = vector.multi_reduction <add>, %250, %cst_134 [1] : vector<5x32xf32> to vector<5xf32>
    %252 = vector.shape_cast %251 : vector<5xf32> to vector<5x1xf32>
    %cst_135 = arith.constant 3.200000e+01 : f32
    %253 = vector.broadcast %cst_135 : f32 to vector<5x1xf32>
    %254 = arith.divf %252, %253 : vector<5x1xf32>
    %cst_136 = arith.constant 9.99999974E-6 : f32
    %255 = vector.broadcast %cst_136 : f32 to vector<5x1xf32>
    %256 = arith.addf %254, %255 : vector<5x1xf32>
    %257 = math.rsqrt %256 : vector<5x1xf32>
    %258 = vector.broadcast %257 : vector<5x1xf32> to vector<5x32xf32>
    %259 = arith.mulf %249, %258 : vector<5x32xf32>
    %260 = vector.broadcast %241 : vector<1x32xf32> to vector<5x32xf32>
    %261 = arith.mulf %259, %260 : vector<5x32xf32>
    %262 = vector.broadcast %243 : vector<1x32xf32> to vector<5x32xf32>
    %263 = arith.addf %261, %262 : vector<5x32xf32>
    %c1_137 = arith.constant 1 : index
    %c0_138 = arith.constant 0 : index
    %c0_139 = arith.constant 0 : index
    %264 = vector.load %arg11[%c1_137, %c0_138, %c0_139] : memref<2x32x64xf32, #tpu.memory_space<vmem>>, vector<1x32x64xf32>
    %265 = vector.shape_cast %264 : vector<1x32x64xf32> to vector<32x64xf32>
    %cst_140 = arith.constant dense<0.000000e+00> : vector<5x64xf32>
    %266 = tpu.matmul %263, %265, %cst_140 {dimension_numbers = #tpu.dot_dimension_numbers<[1], [0], [0], [1], [0, 0, 1, 1], [], []>} : vector<5x32xf32>, vector<32x64xf32>, vector<5x64xf32> -> vector<5x64xf32>
    %c1_141 = arith.constant 1 : index
    %c0_142 = arith.constant 0 : index
    %c0_143 = arith.constant 0 : index
    %267 = vector.load %arg12[%c1_141, %c0_142, %c0_143] : memref<2x1x64xf32, #tpu.memory_space<vmem>>, vector<1x1x64xf32>
    %268 = vector.shape_cast %267 : vector<1x1x64xf32> to vector<1x64xf32>
    %269 = vector.broadcast %268 : vector<1x64xf32> to vector<5x64xf32>
    %270 = arith.addf %266, %269 : vector<5x64xf32>
    %cst_144 = arith.constant 5.000000e-01 : f32
    %271 = vector.broadcast %cst_144 : f32 to vector<5x64xf32>
    %272 = arith.mulf %271, %270 : vector<5x64xf32>
    %cst_145 = arith.constant 0.707106769 : f32
    %273 = vector.broadcast %cst_145 : f32 to vector<5x64xf32>
    %274 = arith.mulf %270, %273 : vector<5x64xf32>
    %cst_146 = arith.constant 0.000000e+00 : f32
    %275 = vector.broadcast %cst_146 : f32 to vector<5x64xf32>
    %276 = arith.cmpf oge, %274, %275 : vector<5x64xf32>
    %cst_147 = arith.constant 1.000000e+00 : f32
    %cst_148 = arith.constant -1.000000e+00 : f32
    %277 = vector.broadcast %cst_147 : f32 to vector<5x64xf32>
    %278 = vector.broadcast %cst_148 : f32 to vector<5x64xf32>
    %279 = arith.select %276, %277, %278 : vector<5x64xi1>, vector<5x64xf32>
    %280 = math.absf %274 : vector<5x64xf32>
    %cst_149 = arith.constant 0.327591091 : f32
    %281 = vector.broadcast %cst_149 : f32 to vector<5x64xf32>
    %282 = arith.mulf %281, %280 : vector<5x64xf32>
    %cst_150 = arith.constant 1.000000e+00 : f32
    %283 = vector.broadcast %cst_150 : f32 to vector<5x64xf32>
    %284 = arith.addf %283, %282 : vector<5x64xf32>
    %cst_151 = arith.constant 1.000000e+00 : f32
    %285 = vector.broadcast %cst_151 : f32 to vector<5x64xf32>
    %286 = arith.divf %285, %284 : vector<5x64xf32>
    %cst_152 = arith.constant 1.06140542 : f32
    %287 = vector.broadcast %cst_152 : f32 to vector<5x64xf32>
    %288 = arith.mulf %287, %286 : vector<5x64xf32>
    %cst_153 = arith.constant -1.45315206 : f32
    %289 = vector.broadcast %cst_153 : f32 to vector<5x64xf32>
    %290 = arith.addf %288, %289 : vector<5x64xf32>
    %291 = arith.mulf %290, %286 : vector<5x64xf32>
    %cst_154 = arith.constant 1.42141378 : f32
    %292 = vector.broadcast %cst_154 : f32 to vector<5x64xf32>
    %293 = arith.addf %291, %292 : vector<5x64xf32>
    %294 = arith.mulf %293, %286 : vector<5x64xf32>
    %cst_155 = arith.constant -0.284496725 : f32
    %295 = vector.broadcast %cst_155 : f32 to vector<5x64xf32>
    %296 = arith.addf %294, %295 : vector<5x64xf32>
    %297 = arith.mulf %296, %286 : vector<5x64xf32>
    %cst_156 = arith.constant 0.254829586 : f32
    %298 = vector.broadcast %cst_156 : f32 to vector<5x64xf32>
    %299 = arith.addf %297, %298 : vector<5x64xf32>
    %300 = arith.mulf %299, %286 : vector<5x64xf32>
    %cst_157 = arith.constant 0.000000e+00 : f32
    %301 = vector.broadcast %cst_157 : f32 to vector<5x64xf32>
    %302 = arith.subf %301, %280 : vector<5x64xf32>
    %303 = arith.mulf %302, %280 : vector<5x64xf32>
    %304 = math.exp %303 : vector<5x64xf32>
    %305 = arith.mulf %300, %304 : vector<5x64xf32>
    %cst_158 = arith.constant 1.000000e+00 : f32
    %306 = vector.broadcast %cst_158 : f32 to vector<5x64xf32>
    %307 = arith.subf %306, %305 : vector<5x64xf32>
    %308 = arith.mulf %279, %307 : vector<5x64xf32>
    %cst_159 = arith.constant 1.000000e+00 : f32
    %309 = vector.broadcast %cst_159 : f32 to vector<5x64xf32>
    %310 = arith.addf %309, %308 : vector<5x64xf32>
    %311 = arith.mulf %272, %310 : vector<5x64xf32>
    %c1_160 = arith.constant 1 : index
    %c0_161 = arith.constant 0 : index
    %c0_162 = arith.constant 0 : index
    %312 = vector.load %arg13[%c1_160, %c0_161, %c0_162] : memref<2x64x32xf32, #tpu.memory_space<vmem>>, vector<1x64x32xf32>
    %313 = vector.shape_cast %312 : vector<1x64x32xf32> to vector<64x32xf32>
    %cst_163 = arith.constant dense<0.000000e+00> : vector<5x32xf32>
    %314 = tpu.matmul %311, %313, %cst_163 {dimension_numbers = #tpu.dot_dimension_numbers<[1], [0], [0], [1], [0, 0, 1, 1], [], []>} : vector<5x64xf32>, vector<64x32xf32>, vector<5x32xf32> -> vector<5x32xf32>
    %315 = arith.addf %239, %314 : vector<5x32xf32>
    %c1_164 = arith.constant 1 : index
    %c0_165 = arith.constant 0 : index
    %c0_166 = arith.constant 0 : index
    %316 = vector.load %arg14[%c1_164, %c0_165, %c0_166] : memref<2x1x32xf32, #tpu.memory_space<vmem>>, vector<1x1x32xf32>
    %317 = vector.shape_cast %316 : vector<1x1x32xf32> to vector<1x32xf32>
    %318 = vector.broadcast %317 : vector<1x32xf32> to vector<5x32xf32>
    %319 = arith.addf %315, %318 : vector<5x32xf32>
    %c0_167 = arith.constant 0 : index
    %c0_168 = arith.constant 0 : index
    %c0_169 = arith.constant 0 : index
    %320 = vector.load %arg15[%c0_167, %c0_168, %c0_169] : memref<1x5x32xf32, #tpu.memory_space<vmem>>, vector<1x5x32xf32>
    %321 = vector.shape_cast %320 : vector<1x5x32xf32> to vector<5x32xf32>
    %322 = vector.shape_cast %319 : vector<5x32xf32> to vector<1x5x32xf32>
    tpu.vector_store %arg15[%c0_167, %c0_168, %c0_169], %322 {strides = array<i32>} : memref<1x5x32xf32, #tpu.memory_space<vmem>>, vector<1x5x32xf32>,
    return
  }
  func.func @transform_0(%arg0: i32) -> (i32, i32, i32) {
    %c0_i32 = arith.constant 0 : i32
    %c0_i32_0 = arith.constant 0 : i32
    %c0_i32_1 = arith.constant 0 : i32
    return %arg0, %c0_i32, %c0_i32_0 : i32, i32, i32
  }
  func.func @transform_1(%arg0: i32) -> (i32, i32) {
    %c0_i32 = arith.constant 0 : i32
    %c0_i32_0 = arith.constant 0 : i32
    %c0_i32_1 = arith.constant 0 : i32
    return %c0_i32, %c0_i32_0 : i32, i32
  }
  func.func @transform_2(%arg0: i32) -> (i32, i32) {
    %c0_i32 = arith.constant 0 : i32
    %c0_i32_0 = arith.constant 0 : i32
    %c0_i32_1 = arith.constant 0 : i32
    return %c0_i32, %c0_i32_0 : i32, i32
  }
  func.func @transform_3(%arg0: i32) -> (i32, i32, i32) {
    %c0_i32 = arith.constant 0 : i32
    %c0_i32_0 = arith.constant 0 : i32
    %c0_i32_1 = arith.constant 0 : i32
    %c0_i32_2 = arith.constant 0 : i32
    return %c0_i32, %c0_i32_0, %c0_i32_1 : i32, i32, i32
  }
  func.func @transform_4(%arg0: i32) -> (i32, i32, i32) {
    %c0_i32 = arith.constant 0 : i32
    %c0_i32_0 = arith.constant 0 : i32
    %c0_i32_1 = arith.constant 0 : i32
    %c0_i32_2 = arith.constant 0 : i32
    return %c0_i32, %c0_i32_0, %c0_i32_1 : i32, i32, i32
  }
  func.func @transform_5(%arg0: i32) -> (i32, i32, i32) {
    %c0_i32 = arith.constant 0 : i32
    %c0_i32_0 = arith.constant 0 : i32
    %c0_i32_1 = arith.constant 0 : i32
    %c0_i32_2 = arith.constant 0 : i32
    return %c0_i32, %c0_i32_0, %c0_i32_1 : i32, i32, i32
  }
  func.func @transform_6(%arg0: i32) -> (i32, i32, i32) {
    %c0_i32 = arith.constant 0 : i32
    %c0_i32_0 = arith.constant 0 : i32
    %c0_i32_1 = arith.constant 0 : i32
    %c0_i32_2 = arith.constant 0 : i32
    return %c0_i32, %c0_i32_0, %c0_i32_1 : i32, i32, i32
  }
  func.func @transform_7(%arg0: i32) -> (i32, i32, i32) {
    %c0_i32 = arith.constant 0 : i32
    %c0_i32_0 = arith.constant 0 : i32
    %c0_i32_1 = arith.constant 0 : i32
    %c0_i32_2 = arith.constant 0 : i32
    return %c0_i32, %c0_i32_0, %c0_i32_1 : i32, i32, i32
  }
  func.func @transform_8(%arg0: i32) -> (i32, i32, i32) {
    %c0_i32 = arith.constant 0 : i32
    %c0_i32_0 = arith.constant 0 : i32
    %c0_i32_1 = arith.constant 0 : i32
    %c0_i32_2 = arith.constant 0 : i32
    return %c0_i32, %c0_i32_0, %c0_i32_1 : i32, i32, i32
  }
  func.func @transform_9(%arg0: i32) -> (i32, i32, i32) {
    %c0_i32 = arith.constant 0 : i32
    %c0_i32_0 = arith.constant 0 : i32
    %c0_i32_1 = arith.constant 0 : i32
    %c0_i32_2 = arith.constant 0 : i32
    return %c0_i32, %c0_i32_0, %c0_i32_1 : i32, i32, i32
  }
  func.func @transform_10(%arg0: i32) -> (i32, i32, i32) {
    %c0_i32 = arith.constant 0 : i32
    %c0_i32_0 = arith.constant 0 : i32
    %c0_i32_1 = arith.constant 0 : i32
    %c0_i32_2 = arith.constant 0 : i32
    return %c0_i32, %c0_i32_0, %c0_i32_1 : i32, i32, i32
  }
  func.func @transform_11(%arg0: i32) -> (i32, i32, i32) {
    %c0_i32 = arith.constant 0 : i32
    %c0_i32_0 = arith.constant 0 : i32
    %c0_i32_1 = arith.constant 0 : i32
    %c0_i32_2 = arith.constant 0 : i32
    return %c0_i32, %c0_i32_0, %c0_i32_1 : i32, i32, i32
  }
  func.func @transform_12(%arg0: i32) -> (i32, i32, i32) {
    %c0_i32 = arith.constant 0 : i32
    %c0_i32_0 = arith.constant 0 : i32
    %c0_i32_1 = arith.constant 0 : i32
    %c0_i32_2 = arith.constant 0 : i32
    return %c0_i32, %c0_i32_0, %c0_i32_1 : i32, i32, i32
  }
  func.func @transform_13(%arg0: i32) -> (i32, i32, i32) {
    %c0_i32 = arith.constant 0 : i32
    %c0_i32_0 = arith.constant 0 : i32
    %c0_i32_1 = arith.constant 0 : i32
    %c0_i32_2 = arith.constant 0 : i32
    return %c0_i32, %c0_i32_0, %c0_i32_1 : i32, i32, i32
  }
  func.func @transform_14(%arg0: i32) -> (i32, i32, i32) {
    %c0_i32 = arith.constant 0 : i32
    %c0_i32_0 = arith.constant 0 : i32
    %c0_i32_1 = arith.constant 0 : i32
    return %arg0, %c0_i32, %c0_i32_0 : i32, i32, i32
  }
}

</mosaic_0001>

<bundles_post_ra>
// kernel: trans_encoder_forward.1
= control target key start
LH: loop header
LB: loop body
LE: loop exit
PB: predicated region body
PF: predicated region fallthrough
CT: control target
= control target key end

     0   :  { %s1633_s29 = smov 0   ;;  %s1957_s0 = inlined_call_operand.vmem [shape: f32[2,4,128], index: 0, kind: input, shape index: {}]   ;;  %s1958_s1 = inlined_call_operand.vmem [shape: f32[128,32], index: 1, kind: input, shape index: {}]   ;;  %s1959_s2 = inlined_call_operand.vmem [shape: f32[5,32], index: 2, kind: input, shape index: {}]   ;;  %s1960_s3 = inlined_call_operand.vmem [shape: f32[2,1,32], index: 3, kind: input, shape index: {}]   ;;  %s1961_s4 = inlined_call_operand.vmem [shape: f32[2,1,32], index: 4, kind: input, shape index: {}]   ;;  %s1962_s5 = inlined_call_operand.vmem [shape: f32[2,32,96], index: 5, kind: input, shape index: {}]   ;;  %s1963_s6 = inlined_call_operand.vmem [shape: f32[4,16,32], index: 6, kind: input, shape index: {}]   ;;  %s1964_s7 = inlined_call_operand.vmem [shape: f32[2,1,32], index: 7, kind: input, shape index: {}]   ;;  %s1965_s8 = inlined_call_operand.vmem [shape: f32[2,1,32], index: 8, kind: input, shape index: {}]   ;;  %s1966_s9 = inlined_call_operand.vmem [shape: f32[2,1,32], index: 9, kind: input, shape index: {}]   ;;  %s1967_s10 = inlined_call_operand.vmem [shape: f32[2,32,64], index: 10, kind: input, shape index: {}]   ;;  %s1968_s11 = inlined_call_operand.vmem [shape: f32[2,1,64], index: 11, kind: input, shape index: {}]   ;;  %s1969_s12 = inlined_call_operand.vmem [shape: f32[2,64,32], index: 12, kind: input, shape index: {}]   ;;  %s1970_s13 = inlined_call_operand.vmem [shape: f32[2,1,32], index: 13, kind: input, shape index: {}]   ;;  %s1971_s14 = inlined_call_operand.vmem [shape: f32[2,5,32], index: 14, kind: output, shape index: {}]  }
   0x1 LB: > { %s1416_s30 = sadd.s32 4294967295, %s1549_s29   ;;  %p1420_p0 = scmp.ge.s32.totalorder %s1549_s29, 1  ;;  %s1549_s29 = sphi %s1633_s29, %s24_s29  }
   0x2   : > { %p411_p1 = scmp.lt.s32.totalorder %s1549_s29, 3 }
   0x4   : > { %p412_p2 = pnand %p1420_p0, %p411_p1 }
   0x5   : > { %p455_p3 = scmp.lt.s32.totalorder (!%p412_p2), %s1416_s30, 1  ;;  %s1552_s23 = smov (!%p412_p2), 80  }
   0x6   : > { %415 = sbr.rel (%p412_p2) target bundleno = 4123 (0x101b), region = 76  ;;  %s1553_s24 = smov (!%p412_p2), 64  }
   0x7   : > { %s1554_s25 = smov (!%p412_p2), 96   ;;  %s1555_s26 = smov (!%p412_p2), 48  }
   0x8   : > { %s1556_s27 = smov (!%p412_p2), 112  }
   0xb   : > { %v483_v0 = vld [vmem:[%s1958_s1 + $0x78] sm:$0xff]  ;;  %v482_v1 = vld [vmem:[%s1958_s1 + $0x70] sm:$0xff]  ;;  %v481_v2 = vld [vmem:[%s1958_s1 + $0x68] sm:$0xff]  ;;  %vm464_vm0 = vcmask 258048   ;;  %s1973_s30 = smov (!%p455_p3, %s1416_s30), 1  ;;  %vm505_vm1 = vcmask 257024  }
   0xc   : > { %484 = vmatpush.msra.mxu0 %v483_v0  ;;  %v480_v3 = vld [vmem:[%s1958_s1 + $0x60] sm:$0xff]  ;;  %v479_v5 = vld [vmem:[%s1958_s1 + $0x58] sm:$0xff]  ;;  %v478_v6 = vld [vmem:[%s1958_s1 + $0x50] sm:$0xff]  ;;  %s1421_s15 = sshll.u32 %s1973_s30, 2  ;;  %v1551_v23 = vmov 32.0   ;;  %vm551_vm6 = vcmask 261120  }
   0xd   : > { %v463_v4 = vld [vmem:[%s1959_s2] sm:$0x1f]  ;;  %v477_v7 = vld [vmem:[%s1958_s1 + $0x48] sm:$0xff]  ;;  %v475_v9 = vld [vmem:[%s1958_s1 + $0x38] sm:$0xff]  ;;  %s458_s22 = scalar_lea.vmem %s1957_s0, %s1421_s15  ;;  %1509 = vrcp.f32 %v1551_v23  ;;  %vm635_vm7 = vcmask 1044480   ;;  %vm578_vm8 = vcmask 130048  }
   0xe   : > { %485 = vmatpush.msra.mxu0 %v482_v1  ;;  %465 = vst.msk [vmem:[#allocation2] sm:$0x1f] %vm464_vm0, %v463_v4  ;;  %v476_v8 = vld [vmem:[%s1958_s1 + $0x40] sm:$0xff]  ;;  %v474_v10 = vld [vmem:[%s1958_s1 + $0x30] sm:$0xff]  ;;  %v473_v11 = vld [vmem:[%s1958_s1 + $0x28] sm:$0xff]  ;;  %vm604_vm9 = vcmask 36864  }
   0xf   : > { %v472_v12 = vld [vmem:[%s1958_s1 + $0x20] sm:$0xff]  ;;  %v471_v13 = vld [vmem:[%s1958_s1 + $0x18] sm:$0xff]  ;;  %v470_v14 = vld [vmem:[%s1958_s1 + $0x10] sm:$0xff]  ;;  %vm631_vm14 = vcmask 39936   ;;  %s1422_s21 = sshll.u32 %s1973_s30, 3 }
  0x10   : > { %486 = vmatpush.msra.mxu0 %v481_v2  ;;  %v469_v15 = vld [vmem:[%s1958_s1 + $0x8] sm:$0xff]  ;;  %v468_v16 = vld [vmem:[%s1958_s1] sm:$0xff]  ;;  %v550_v35 = vld [vmem:[%s1962_s5 + $0x18] sm:$0xff] }
  0x11   : > { %v467_v17 = vld [vmem:[%s458_s22] sm:$0xf]  ;;  %567 = vmatpush.msra.mxu1 %v550_v35  ;;  %v549_v36 = vld [vmem:[%s1962_s5 + $0x10] sm:$0xff]  ;;  %v548_v37 = vld [vmem:[%s1962_s5 + $0x8] sm:$0xff] }
  0x12   : > { %487 = vmatpush.msra.mxu0 %v480_v3  ;;  %v547_v38 = vld [vmem:[%s1962_s5] sm:$0xff] }
  0x13   : > { %v1510_v24 = vpop.eup %1509  ;;  %568 = vmatpush.msra.mxu1 %v549_v36  ;;  %v1495_v48 = vld [vmem:[%s1960_s3] ss:$0 sm:$0xff] }
  0x14   : > { %488 = vmatpush.msra.mxu0 %v479_v5  ;;  %v514_v25 = vmul.f32 32.0, %v1510_v24  ;;  %vm518_vm2 = vweird.f32 %v1510_v24  ;;  %v1496_v51 = vld [vmem:[%s1961_s4] ss:$0 sm:$0xff] }
  0x15   : > { %v466_v18 = vld [vmem:[#allocation2 + $0x1] sm:$0xf]  ;;  %569 = vmatpush.msra.mxu1 %v548_v37 }
  0x16   : > { %489 = vmatpush.msra.mxu0 %v478_v6  ;;  %v515_v26 = vsub.f32 1.0, %v514_v25 }
  0x17   : > { %570 = vmatpush.msra.mxu1 %v547_v38 }
  0x18   : > { %490 = vmatpush.msra.mxu0 %v477_v7  ;;  %v516_v27 = vmul.f32 %v1510_v24, %v515_v26 }
  0x1a   : > { %491 = vmatpush.msra.mxu0 %v476_v8  ;;  %v517_v28 = vadd.f32 %v1510_v24, %v516_v27 }
  0x1c   : > { %492 = vmatpush.msra.mxu0 %v475_v9  ;;  %v1707_v29 = vsel %vm518_vm2, %v1510_v24, %v517_v28  ;;  %v1433_v28 = vld [vmem:[%s1963_s6 + $0x18] sm:$0xff] }
  0x1d   : > { %760 = vmatpush.msrb.mxu1 %v1433_v28  ;;  %v899_v28 = vld [vmem:[%s1969_s12 + $0x8] sm:$0xff] }
  0x1e   : > { %493 = vmatpush.msra.mxu0 %v474_v10 }
  0x20   : > { %494 = vmatpush.msra.mxu0 %v473_v11 }
  0x22   : > { %495 = vmatpush.msra.mxu0 %v472_v12 }
  0x24   : > { %496 = vmatpush.msra.mxu0 %v471_v13 }
  0x26   : > { %497 = vmatpush.msra.mxu0 %v470_v14 }
  0x28   : > { %498 = vmatpush.msra.mxu0 %v469_v15  ;;  %v659_v15 = vld [vmem:[%s1963_s6 + $0x8] sm:$0xff] }
  0x2a   : > { %499 = vmatpush.msra.mxu0 %v468_v16 }
  0x2b   : > { %500 = vmatmul.f32.vlgmr.msra.gmra.mxu0 %v467_v17  ;;  %v658_v17 = vld [vmem:[%s1963_s6] sm:$0xff] }
  0xa8   : > { %v501_v19 = vpop.f32.mrf.mxu0 }
  0xa9   : > { %v504_v20 = vadd.f32 %v501_v19, %v466_v18 }
  0xab   : > { %506 = vst.msk [vmem:[#allocation2 + $0x1] sm:$0xf] %vm505_vm1, %v504_v20 }
  0xb2   : > { %v1703_v21 = vld [vmem:[#allocation2] sm:$0x1f] }
  0xb3   : > { %v510_v22 = vsel %vm464_vm0, %v1703_v21, 0.0 }
  0xb4   : > { %511 = vadd.xlane.f32.xlu0 %v510_v22 }
 0x127   : > { %v512_v30 = vpop.xlane.xlu0 %511 }
 0x128   : > { %v520_v31 = vmul.f32 %v1707_v29, %v512_v30 }
 0x12a   : > { %v521_v32 = vsub.f32 %v1703_v21, %v520_v31 }
 0x12c   : > { %v522_v33 = vmul.f32 %v521_v32, %v521_v32 }
 0x12e   : > { %v523_v34 = vsel %vm464_vm0, %v522_v33, 0.0 }
 0x12f   : > { %524 = vadd.xlane.f32.xlu0 %v523_v34 }
 0x1a2   : > { %v525_v39 = vpop.xlane.xlu0 %524 }
 0x1a3   : > { %v526_v40 = vmul.f32 %v525_v39, %v1707_v29 }
 0x1a5   : > { %v527_v41 = vadd.f32 1e-05, %v526_v40 }
 0x1a7   : > { %1511 = vrsqrt.f32 %v527_v41  ;;  %vm534_vm4 = vweird.f32 %v527_v41 }
 0x1ad   : > { %v1512_v42 = vpop.eup %1511 }
 0x1ae   : > { %v529_v43 = vmul.f32 %v1512_v42, %v527_v41  ;;  %vm535_vm3 = vweird.f32 %v1512_v42 }
 0x1af   : > { %vm536_vm5 = vmor %vm534_vm4, %vm535_vm3 }
 0x1b0   : > { %v530_v44 = vmul.f32 %v1512_v42, %v529_v43 }
 0x1b2   : > { %v531_v45 = vmul.f32 0.5, %v530_v44 }
 0x1b4   : > { %v532_v46 = vsub.f32 1.5, %v531_v45 }
 0x1b6   : > { %v533_v47 = vmul.f32 %v1512_v42, %v532_v46 }
 0x1b8   : > { %v537_v49 = vsel %vm536_vm5, %v1512_v42, %v533_v47  ;;  %v1432_v42 = vld [vmem:[%s1963_s6 + $0x10] sm:$0xff]  ;;  %v1497_v47 = vld [vmem:[%s1964_s7] ss:$0 sm:$0xff] }
 0x1b9   : > { %v538_v50 = vmul.f32 %v537_v49, %v521_v32  ;;  %761 = vmatpush.msrb.mxu1 %v1432_v42 }
 0x1bb   : > { %v542_v52 = vmul.f32 %v1495_v48, %v538_v50 }
 0x1bd   : > { %v546_v53 = vadd.f32 %v1496_v51, %v542_v52 }
 0x1bf   : > { %1423 = vmatmul.msk.f32.vlgmr.msra.gmra.mxu1 %vm551_vm6, %v546_v53 }
 0x23c   : > { %v572_v54 = vpop.f32.mrf.mxu1 }
 0x23d   : > { %662 = vrot.lane.b32.xlu0 %v572_v54, %s1552_s23  ;;  %629 = vrot.lane.b32.xlu2 %v572_v54, %s1553_s24 }
 0x23e   : > { %576 = vrot.lane.b32.xlu1 %v572_v54, %s1554_s25 }
 0x297   : > { %v630_v55 = vpop.permute.xlu2 %629 }
 0x298   : > { %1426 = vmatpush.msk.msra.mxu3 %vm635_vm7, %v630_v55 }
 0x2af   : > { %v663_v56 = vpop.permute.xlu0 %662 }
 0x2b0   : > { %v577_v57 = vpop.permute.xlu1 %576  ;;  %1428 = vmatpush.xpose.msk.msrb.mxu3 %vm578_vm8, %v663_v56  ;;  %v830_v56 = vld [vmem:[%s1967_s10 + $0x18] sm:$0xff] }
 0x2b1   : > { %1424 = vmatpush.xpose.msk.msra.mxu2 %vm578_vm8, %v577_v57  ;;  %v828_v57 = vld [vmem:[%s1967_s10 + $0x8] sm:$0xff] }
 0x2b4   : > { %1425 = vmatmul.msk.f32.vlgmr.msra.gmra.mxu2 %vm578_vm8, %v572_v54 }
 0x337   : > { %v600_v58 = vpop.f32.mrf.mxu2 }
 0x338   : > { %v603_v59 = vmul.f32 0.25, %v600_v58  ;;  %v827_v58 = vld [vmem:[%s1967_s10] sm:$0xff] }
 0x33a   : > { %v605_v60 = vsel %vm604_vm9, %v603_v59, -inf }
 0x33b   : > { %606 = vmax.xlane.f32.xlu1 %v605_v60 }
 0x354   : > { %713 = vrot.lane.b32.xlu1 %v572_v54, %s1555_s26 }
 0x3ae   : > { %v607_v61 = vpop.xlane.xlu1 %606 }
 0x3af   : > { %v608_v62 = vsub.f32 %v603_v59, %v607_v61 }
 0x3b1   : > { %v609_v63 = vmul.f32 1.442695, %v608_v62 }
 0x3b3   : > { %1513 = vpow2.f32 %v609_v63 }
 0x3b9   : > { %v1514_v0 = vpop.eup %1513 }
 0x3ba   : > { %v611_v1 = vsel %vm604_vm9, %v1514_v0, 0.0 }
 0x3bb   : > { %612 = vadd.xlane.f32.xlu2 %v611_v1 }
 0x3c6   : > { %v714_v2 = vpop.permute.xlu1 %713 }
 0x3c7   : > { %1430 = vmatpush.msk.msrb.mxu2 %vm635_vm7, %v714_v2 }
 0x3c9   : > { %850 = vmatpush.msra.mxu2 %v830_v56 }
 0x3d3   : > { %660 = vrot.lane.b32.xlu2 %v572_v54, %s1556_s27 }
 0x42e   : > { %v613_v3 = vpop.xlane.xlu2 %612 }
 0x42f   : > { %1515 = vrcp.f32 %v613_v3  ;;  %v625_v7 = vand.u32 2147483648, %v613_v3  ;;  %v623_v9 = vand.u32 2147483647, %v613_v3  ;;  %vm619_vm11 = vweird.f32 %v613_v3 }
 0x431   : > { %v626_v11 = vor.u32 1.1754944e-38, %v625_v7  ;;  %vm624_vm13 = vcmp.eq.f32.partialorder %v623_v9, 8.507059e+37  ;;  %v1499_v7 = vld [vmem:[%s1966_s9] ss:$0 sm:$0xff] }
 0x435   : > { %v1516_v4 = vpop.eup %1515 }
 0x436   : > { %v615_v5 = vmul.f32 %v1516_v4, %v613_v3  ;;  %vm620_vm10 = vweird.f32 %v1516_v4  ;;  %v661_v16 = vpop.permute.xlu2 %660 }
 0x437   : > { %vm621_vm12 = vmor %vm619_vm11, %vm620_vm10 }
 0x438   : > { %v616_v6 = vsub.f32 1.0, %v615_v5 }
 0x43a   : > { %v617_v8 = vmul.f32 %v1516_v4, %v616_v6 }
 0x43c   : > { %v618_v10 = vadd.f32 %v1516_v4, %v617_v8 }
 0x43e   : > { %v622_v12 = vsel %vm621_vm12, %v1516_v4, %v618_v10  ;;  %v1498_v4 = vld [vmem:[%s1965_s8] ss:$0 sm:$0xff] }
 0x43f   : > { %v627_v13 = vsel %vm624_vm13, %v626_v11, %v622_v12  ;;  %v1500_v10 = vld [vmem:[%s1968_s11] ss:$0 sm:$0xff] }
 0x440   : > { %v628_v14 = vmul.f32 %v1514_v0, %v627_v13 }
 0x442   : > { %1427 = vmatmul.msk.f32.vlgmr.msra.gmra.mxu3 %vm631_vm14, %v628_v14 }
 0x443   : > { %783 = vmatpush.msra.mxu3 %v659_v15 }
 0x445   : > { %784 = vmatpush.msra.mxu3 %v658_v17  ;;  %v905_v17 = vld [vmem:[%s1969_s12 + $0x38] sm:$0xff] }
 0x446   : > { %918 = vmatpush.msra.mxu1 %v905_v17 }
 0x44a   : > { %1429 = vmatmul.msk.f32.vlgmr.msrb.gmra.mxu3 %vm578_vm8, %v661_v16 }
 0x4c5   : > { %v655_v18 = vpop.f32.mrf.mxu3 }
 0x4c6   : > { %1435 = vmatmul.msk.f32.vlgmr.msra.gmra.mxu3 %vm578_vm8, %v655_v18  ;;  %v904_v18 = vld [vmem:[%s1969_s12 + $0x30] sm:$0xff] }
 0x4c7   : > { %919 = vmatpush.msra.mxu1 %v904_v18 }
 0x4cd   : > { %v685_v19 = vpop.f32.mrf.mxu3 }
 0x4ce   : > { %v688_v20 = vmul.f32 0.25, %v685_v19  ;;  %v903_v19 = vld [vmem:[%s1969_s12 + $0x28] sm:$0xff] }
 0x4cf   : > { %920 = vmatpush.msra.mxu1 %v903_v19  ;;  %v1503_v19 = vld [vmem:[%s1961_s4 + $0x1] ss:$0 sm:$0xff] }
 0x4d0   : > { %v689_v22 = vsel %vm604_vm9, %v688_v20, -inf }
 0x4d1   : > { %690 = vmax.xlane.f32.xlu0 %v689_v22 }
 0x544   : > { %v691_v23 = vpop.xlane.xlu0 %690 }
 0x545   : > { %v692_v24 = vsub.f32 %v688_v20, %v691_v23  ;;  %v902_v20 = vld [vmem:[%s1969_s12 + $0x20] sm:$0xff]  ;;  %v901_v23 = vld [vmem:[%s1969_s12 + $0x18] sm:$0xff] }
 0x546   : > { %921 = vmatpush.msra.mxu1 %v902_v20 }
 0x547   : > { %v693_v25 = vmul.f32 1.442695, %v692_v24 }
 0x548   : > { %922 = vmatpush.msra.mxu1 %v901_v23 }
 0x549   : > { %1517 = vpow2.f32 %v693_v25  ;;  %v786_v44 = vpop.f32.mrf.mxu3  ;;  %v900_v25 = vld [vmem:[%s1969_s12 + $0x10] sm:$0xff] }
 0x54a   : > { %923 = vmatpush.msra.mxu1 %v900_v25 }
 0x54c   : > { %924 = vmatpush.msra.mxu1 %v899_v28 }
 0x54f   : > { %v1518_v26 = vpop.eup %1517 }
 0x550   : > { %v695_v27 = vsel %vm604_vm9, %v1518_v26, 0.0 }
 0x551   : > { %696 = vadd.xlane.f32.xlu2 %v695_v27 }
 0x5c4   : > { %v697_v30 = vpop.xlane.xlu2 %696 }
 0x5c5   : > { %1519 = vrcp.f32 %v697_v30  ;;  %v709_v34 = vand.u32 2147483648, %v697_v30  ;;  %v707_v36 = vand.u32 2147483647, %v697_v30  ;;  %vm703_vm1 = vweird.f32 %v697_v30 }
 0x5c7   : > { %v710_v38 = vor.u32 1.1754944e-38, %v709_v34  ;;  %vm708_vm3 = vcmp.eq.f32.partialorder %v707_v36, 8.507059e+37 }
 0x5cb   : > { %v1520_v31 = vpop.eup %1519 }
 0x5cc   : > { %v699_v32 = vmul.f32 %v1520_v31, %v697_v30  ;;  %vm704_vm15 = vweird.f32 %v1520_v31 }
 0x5cd   : > { %vm705_vm2 = vmor %vm703_vm1, %vm704_vm15 }
 0x5ce   : > { %v700_v33 = vsub.f32 1.0, %v699_v32  ;;  %v898_v32 = vld [vmem:[%s1969_s12] sm:$0xff] }
 0x5cf   : > { %925 = vmatpush.msra.mxu1 %v898_v32 }
 0x5d0   : > { %v701_v35 = vmul.f32 %v1520_v31, %v700_v33 }
 0x5d2   : > { %v702_v37 = vadd.f32 %v1520_v31, %v701_v35 }
 0x5d4   : > { %v706_v39 = vsel %vm705_vm2, %v1520_v31, %v702_v37  ;;  %vm906_vm2 = vcmask 523264  }
 0x5d5   : > { %v711_v40 = vsel %vm708_vm3, %v710_v38, %v706_v39 }
 0x5d6   : > { %v712_v41 = vmul.f32 %v1518_v26, %v711_v40 }
 0x5d8   : > { %1431 = vmatmul.msk.f32.vlgmr.msrb.gmra.mxu2 %vm631_vm14, %v712_v41 }
 0x65b   : > { %v737_v43 = vpop.f32.mrf.mxu2 }
 0x65c   : > { %1434 = vmatmul.msk.f32.vlgmr.msrb.gmra.mxu1 %vm578_vm8, %v737_v43 }
 0x6d9   : > { %v763_v45 = vpop.f32.mrf.mxu1 }
 0x6da   : > { %v787_v46 = vadd.f32 %v786_v44, %v763_v45 }
 0x6dc   : > { %v789_v48 = vadd.f32 %v787_v46, %v1703_v21  ;;  %v829_v21 = vld [vmem:[%s1967_s10 + $0x10] sm:$0xff] }
 0x6dd   : > { %851 = vmatpush.msra.mxu2 %v829_v21 }
 0x6de   : > { %v1767_v49 = vadd.f32 %v1497_v47, %v789_v48 }
 0x6df   : > { %852 = vmatpush.msra.mxu2 %v828_v57 }
 0x6e0   : > { %v797_v50 = vsel %vm464_vm0, %v1767_v49, 0.0 }
 0x6e1   : > { %798 = vadd.xlane.f32.xlu1 %v797_v50  ;;  %853 = vmatpush.msra.mxu2 %v827_v58  ;;  %v1501_v58 = vld [vmem:[%s1970_s13] ss:$0 sm:$0xff] }
 0x754   : > { %v799_v51 = vpop.xlane.xlu1 %798 }
 0x755   : > { %v800_v52 = vmul.f32 %v799_v51, %v1707_v29 }
 0x757   : > { %v801_v53 = vsub.f32 %v1767_v49, %v800_v52 }
 0x759   : > { %v802_v54 = vmul.f32 %v801_v53, %v801_v53 }
 0x75b   : > { %v803_v55 = vsel %vm464_vm0, %v802_v54, 0.0 }
 0x75c   : > { %804 = vadd.xlane.f32.xlu0 %v803_v55 }
 0x7cf   : > { %v805_v59 = vpop.xlane.xlu0 %804 }
 0x7d0   : > { %v806_v60 = vmul.f32 %v805_v59, %v1707_v29 }
 0x7d2   : > { %v807_v61 = vadd.f32 1e-05, %v806_v60 }
 0x7d4   : > { %1521 = vrsqrt.f32 %v807_v61  ;;  %vm814_vm5 = vweird.f32 %v807_v61 }
 0x7da   : > { %v1522_v62 = vpop.eup %1521 }
 0x7db   : > { %v809_v63 = vmul.f32 %v1522_v62, %v807_v61  ;;  %vm815_vm4 = vweird.f32 %v1522_v62 }
 0x7dc   : > { %vm816_vm10 = vmor %vm814_vm5, %vm815_vm4 }
 0x7dd   : > { %v810_v0 = vmul.f32 %v1522_v62, %v809_v63 }
 0x7df   : > { %v811_v1 = vmul.f32 0.5, %v810_v0 }
 0x7e1   : > { %v812_v2 = vsub.f32 1.5, %v811_v1 }
 0x7e3   : > { %v813_v3 = vmul.f32 %v1522_v62, %v812_v2 }
 0x7e5   : > { %v817_v5 = vsel %vm816_vm10, %v1522_v62, %v813_v3 }
 0x7e6   : > { %v818_v6 = vmul.f32 %v817_v5, %v801_v53  ;;  %v1557_v53 = vmov -1.0   ;;  %v1441_v5 = vld [vmem:[%s1962_s5 + $0x28] sm:$0xff] }
 0x7e8   : > { %v822_v8 = vmul.f32 %v1498_v4, %v818_v6  ;;  %v1443_v4 = vld [vmem:[%s1962_s5 + $0x38] sm:$0xff]  ;;  %v1440_v6 = vld [vmem:[%s1962_s5 + $0x20] sm:$0xff] }
 0x7e9   : > { %990 = vmatpush.msrb.mxu3 %v1443_v4 }
 0x7ea   : > { %v826_v9 = vadd.f32 %v1499_v7, %v822_v8 }
 0x7ec   : > { %1436 = vmatmul.msk.f32.vlgmr.msra.gmra.mxu2 %vm551_vm6, %v826_v9 }
 0x86f   : > { %v855_v11 = vpop.f32.mrf.mxu2 }
 0x870   : > { %v856_v12 = vadd.f32 %v1500_v10, %v855_v11 }
 0x872   : > { %v859_v13 = vmul.f32 0.70710677, %v856_v12  ;;  %v858_v56 = vmul.f32 0.5, %v856_v12 }
 0x874   : > { %v862_v14 = vand.u32 2147483647, %v859_v13  ;;  %vm860_vm1 = vcmp.ge.f32.partialorder %v859_v13, 0.0 }
 0x875   : > { %v861_v54 = vsel %vm860_vm1, 1.0, %v1557_v53 }
 0x876   : > { %v863_v15 = vmul.f32 0.3275911, %v862_v14  ;;  %v889_v37 = vsub.f32 0.0, %v862_v14 }
 0x878   : > { %v864_v16 = vadd.f32 1.0, %v863_v15  ;;  %v890_v40 = vmul.f32 %v889_v37, %v862_v14 }
 0x87a   : > { %1523 = vrcp.f32 %v864_v16  ;;  %v876_v27 = vand.u32 2147483648, %v864_v16  ;;  %v874_v31 = vand.u32 2147483647, %v864_v16  ;;  %vm870_vm12 = vweird.f32 %v864_v16 }
 0x87b   : > { %v891_v43 = vmul.f32 1.442695, %v890_v40 }
 0x87c   : > { %v877_v34 = vor.u32 1.1754944e-38, %v876_v27  ;;  %vm875_vm15 = vcmp.eq.f32.partialorder %v874_v31, 8.507059e+37 }
 0x87d   : > { %1525 = vpow2.f32 %v891_v43 }
 0x880   : > { %v1524_v22 = vpop.eup %1523 }
 0x881   : > { %v866_v24 = vmul.f32 %v1524_v22, %v864_v16  ;;  %vm871_vm11 = vweird.f32 %v1524_v22  ;;  %v1502_v16 = vld [vmem:[%s1960_s3 + $0x1] ss:$0 sm:$0xff] }
 0x882   : > { %vm872_vm13 = vmor %vm870_vm12, %vm871_vm11 }
 0x883   : > { %v867_v26 = vsub.f32 1.0, %v866_v24  ;;  %v1526_v50 = vpop.eup %1525 }
 0x885   : > { %v868_v30 = vmul.f32 %v1524_v22, %v867_v26 }
 0x887   : > { %v869_v33 = vadd.f32 %v1524_v22, %v868_v30 }
 0x889   : > { %v873_v35 = vsel %vm872_vm13, %v1524_v22, %v869_v33 }
 0x88a   : > { %v878_v36 = vsel %vm875_vm15, %v877_v34, %v873_v35 }
 0x88b   : > { %v880_v38 = vmul.f32 1.0614054, %v878_v36 }
 0x88d   : > { %v881_v39 = vadd.f32 -1.4531521, %v880_v38 }
 0x88f   : > { %v882_v41 = vmul.f32 %v881_v39, %v878_v36 }
 0x891   : > { %v883_v42 = vadd.f32 1.4214138, %v882_v41 }
 0x893   : > { %v884_v44 = vmul.f32 %v883_v42, %v878_v36 }
 0x895   : > { %v885_v45 = vadd.f32 -0.28449672, %v884_v44 }
 0x897   : > { %v886_v46 = vmul.f32 %v885_v45, %v878_v36 }
 0x899   : > { %v887_v47 = vadd.f32 0.2548296, %v886_v46  ;;  %v1456_v46 = vld [vmem:[%s1963_s6 + $0x38] sm:$0xff] }
 0x89b   : > { %v888_v48 = vmul.f32 %v887_v47, %v878_v36 }
 0x89d   : > { %v893_v51 = vmul.f32 %v1526_v50, %v888_v48 }
 0x89f   : > { %v894_v52 = vsub.f32 1.0, %v893_v51 }
 0x8a1   : > { %v895_v55 = vmul.f32 %v894_v52, %v861_v54 }
 0x8a3   : > { %v896_v21 = vadd.f32 1.0, %v895_v55 }
 0x8a5   : > { %v897_v57 = vmul.f32 %v896_v21, %v858_v56 }
 0x8a7   : > { %1437 = vmatmul.msk.f32.vlgmr.msra.gmra.mxu1 %vm906_vm2, %v897_v57 }
 0x924   : > { %v927_v59 = vpop.f32.mrf.mxu1 }
 0x925   : > { %v930_v60 = vadd.f32 %v927_v59, %v1767_v49  ;;  %v1442_v49 = vld [vmem:[%s1962_s5 + $0x30] sm:$0xff] }
 0x926   : > { %991 = vmatpush.msrb.mxu3 %v1442_v49 }
 0x927   : > { %v1827_v61 = vadd.f32 %v1501_v58, %v930_v60 }
 0x928   : > { %992 = vmatpush.msrb.mxu3 %v1441_v5 }
 0x929   : > { %v940_v62 = vsel %vm464_vm0, %v1827_v61, 0.0 }
 0x92a   : > { %941 = vadd.xlane.f32.xlu2 %v940_v62  ;;  %993 = vmatpush.msrb.mxu3 %v1440_v6 }
 0x99d   : > { %v942_v63 = vpop.xlane.xlu2 %941 }
 0x99e   : > { %v943_v0 = vmul.f32 %v942_v63, %v1707_v29 }
 0x9a0   : > { %v944_v1 = vsub.f32 %v1827_v61, %v943_v0 }
 0x9a2   : > { %v945_v2 = vmul.f32 %v944_v1, %v944_v1 }
 0x9a4   : > { %v946_v3 = vsel %vm464_vm0, %v945_v2, 0.0 }
 0x9a5   : > { %947 = vadd.xlane.f32.xlu0 %v946_v3 }
 0xa18   : > { %v948_v7 = vpop.xlane.xlu0 %947 }
 0xa19   : > { %v949_v8 = vmul.f32 %v948_v7, %v1707_v29 }
 0xa1b   : > { %v950_v9 = vadd.f32 1e-05, %v949_v8  ;;  %v1455_v8 = vld [vmem:[%s1963_s6 + $0x30] sm:$0xff] }
 0xa1d   : > { %1527 = vrsqrt.f32 %v950_v9  ;;  %vm957_vm4 = vweird.f32 %v950_v9 }
 0xa23   : > { %v1528_v10 = vpop.eup %1527 }
 0xa24   : > { %v952_v11 = vmul.f32 %v1528_v10, %v950_v9  ;;  %vm958_vm3 = vweird.f32 %v1528_v10  ;;  %v1450_v9 = vld [vmem:[%s1963_s6 + $0x28] sm:$0xff] }
 0xa25   : > { %vm959_vm5 = vmor %vm957_vm4, %vm958_vm3 }
 0xa26   : > { %v953_v12 = vmul.f32 %v1528_v10, %v952_v11 }
 0xa28   : > { %v954_v13 = vmul.f32 0.5, %v953_v12 }
 0xa2a   : > { %v955_v14 = vsub.f32 1.5, %v954_v13 }
 0xa2c   : > { %v956_v15 = vmul.f32 %v1528_v10, %v955_v14 }
 0xa2e   : > { %v960_v17 = vsel %vm959_vm5, %v1528_v10, %v956_v15  ;;  %v1449_v10 = vld [vmem:[%s1963_s6 + $0x20] sm:$0xff] }
 0xa2f   : > { %v961_v18 = vmul.f32 %v960_v17, %v944_v1 }
 0xa31   : > { %v965_v20 = vmul.f32 %v1502_v16, %v961_v18  ;;  %v1504_v16 = vld [vmem:[%s1964_s7 + $0x1] ss:$0 sm:$0xff] }
 0xa33   : > { %v969_v22 = vadd.f32 %v1503_v19, %v965_v20 }
 0xa35   : > { %1444 = vmatmul.msk.f32.vlgmr.msrb.gmra.mxu3 %vm551_vm6, %v969_v22 }
 0xab8   : > { %v995_v23 = vpop.f32.mrf.mxu3 }
 0xab9   : > { %1082 = vrot.lane.b32.xlu0 %v995_v23, %s1552_s23  ;;  %999 = vrot.lane.b32.xlu2 %v995_v23, %s1554_s25 }
 0xac1   : > { %1080 = vrot.lane.b32.xlu2 %v995_v23, %s1556_s27 }
 0xb13   : > { %v1000_v24 = vpop.permute.xlu2 %999 }
 0xb14   : > { %1445 = vmatpush.xpose.msk.msrb.mxu2 %vm578_vm8, %v1000_v24 }
 0xb17   : > { %1446 = vmatmul.msk.f32.vlgmr.msrb.gmra.mxu2 %vm578_vm8, %v995_v23 }
 0xb1b   : > { %v1081_v26 = vpop.permute.xlu2 %1080 }
 0xb2b   : > { %v1083_v25 = vpop.permute.xlu0 %1082 }
 0xb2c   : > { %1451 = vmatpush.xpose.msk.msra.mxu2 %vm578_vm8, %v1083_v25 }
 0xb2f   : > { %1452 = vmatmul.msk.f32.vlgmr.msra.gmra.mxu2 %vm578_vm8, %v1081_v26  ;;  %v1465_v26 = vld [vmem:[%s1967_s10 + $0x38] sm:$0xff] }
 0xb30   : > { %1275 = vmatpush.msrb.mxu2 %v1465_v26 }
 0xb9a   : > { %v1022_v27 = vpop.f32.mrf.mxu2 }
 0xb9b   : > { %v1025_v28 = vmul.f32 0.25, %v1022_v27  ;;  %v1463_v27 = vld [vmem:[%s1967_s10 + $0x28] sm:$0xff] }
 0xb9d   : > { %v1026_v30 = vsel %vm604_vm9, %v1025_v28, -inf }
 0xb9e   : > { %1027 = vmax.xlane.f32.xlu0 %v1026_v30 }
 0xbb2   : > { %1133 = vrot.lane.b32.xlu0 %v995_v23, %s1555_s26  ;;  %v1105_v31 = vpop.f32.mrf.mxu2  ;;  %s462_s26 = scalar_lea.vmem %s1971_s14, %s1422_s21 }
 0xbb3   : > { %v1108_v32 = vmul.f32 0.25, %v1105_v31 }
 0xbb5   : > { %v1109_v33 = vsel %vm604_vm9, %v1108_v32, -inf }
 0xbb6   : > { %1110 = vmax.xlane.f32.xlu1 %v1109_v33 }
 0xc11   : > { %v1028_v34 = vpop.xlane.xlu0 %1027 }
 0xc12   : > { %v1029_v35 = vsub.f32 %v1025_v28, %v1028_v34  ;;  %v1462_v28 = vld [vmem:[%s1967_s10 + $0x20] sm:$0xff] }
 0xc14   : > { %v1030_v36 = vmul.f32 1.442695, %v1029_v35 }
 0xc16   : > { %1529 = vpow2.f32 %v1030_v36 }
 0xc1c   : > { %v1530_v37 = vpop.eup %1529 }
 0xc1d   : > { %v1032_v38 = vsel %vm604_vm9, %v1530_v37, 0.0 }
 0xc1e   : > { %1033 = vadd.xlane.f32.xlu2 %v1032_v38 }
 0xc24   : > { %v1134_v39 = vpop.permute.xlu0 %1133 }
 0xc25   : > { %1453 = vmatpush.msk.msrb.mxu1 %vm635_vm7, %v1134_v39  ;;  %v1505_v39 = vld [vmem:[%s1965_s8 + $0x1] ss:$0 sm:$0xff] }
 0xc27   : > { %1180 = vmatpush.msra.mxu1 %v1456_v46 }
 0xc29   : > { %v1111_v40 = vpop.xlane.xlu1 %1110  ;;  %1181 = vmatpush.msra.mxu1 %v1455_v8 }
 0xc2a   : > { %v1112_v41 = vsub.f32 %v1108_v32, %v1111_v40 }
 0xc2c   : > { %v1113_v42 = vmul.f32 1.442695, %v1112_v41 }
 0xc2e   : > { %1531 = vpow2.f32 %v1113_v42 }
 0xc34   : > { %v1532_v43 = vpop.eup %1531 }
 0xc35   : > { %v1115_v44 = vsel %vm604_vm9, %v1532_v43, 0.0 }
 0xc36   : > { %1116 = vadd.xlane.f32.xlu1 %v1115_v44  ;;  %v1507_v44 = vld [vmem:[%s1968_s11 + $0x1] ss:$0 sm:$0xff] }
 0xc4f   : > { %1050 = vrot.lane.b32.xlu1 %v995_v23, %s1553_s24 }
 0xc91   : > { %v1034_v45 = vpop.xlane.xlu2 %1033 }
 0xc92   : > { %1533 = vrcp.f32 %v1034_v45  ;;  %v1046_v62 = vand.u32 2147483648, %v1034_v45  ;;  %vm1040_vm13 = vweird.f32 %v1034_v45  ;;  %v1044_v0 = vand.u32 2147483647, %v1034_v45 }
 0xc94   : > { %v1047_v49 = vor.u32 1.1754944e-38, %v1046_v62  ;;  %vm1045_vm3 = vcmp.eq.f32.partialorder %v1044_v0, 8.507059e+37 }
 0xc98   : > { %v1534_v47 = vpop.eup %1533 }
 0xc99   : > { %v1036_v50 = vmul.f32 %v1534_v47, %v1034_v45  ;;  %vm1041_vm10 = vweird.f32 %v1534_v47 }
 0xc9a   : > { %vm1042_vm1 = vmor %vm1040_vm13, %vm1041_vm10 }
 0xc9b   : > { %v1037_v51 = vsub.f32 1.0, %v1036_v50 }
 0xc9d   : > { %v1038_v55 = vmul.f32 %v1534_v47, %v1037_v51 }
 0xc9f   : > { %v1039_v59 = vadd.f32 %v1534_v47, %v1038_v55  ;;  %v1473_v55 = vld [vmem:[%s1969_s12 + $0x68] sm:$0xff] }
 0xca1   : > { %v1043_v3 = vsel %vm1042_vm1, %v1534_v47, %v1039_v59  ;;  %v1470_v59 = vld [vmem:[%s1969_s12 + $0x50] sm:$0xff] }
 0xca2   : > { %v1048_v5 = vsel %vm1045_vm3, %v1047_v49, %v1043_v3 }
 0xca3   : > { %v1049_v7 = vmul.f32 %v1530_v37, %v1048_v5 }
 0xca9   : > { %v1117_v48 = vpop.xlane.xlu1 %1116 }
 0xcaa   : > { %1535 = vrcp.f32 %v1117_v48  ;;  %v1129_v21 = vand.u32 2147483648, %v1117_v48  ;;  %v1127_v58 = vand.u32 2147483647, %v1117_v48  ;;  %vm1123_vm11 = vweird.f32 %v1117_v48 }
 0xcac   : > { %v1130_v63 = vor.u32 1.1754944e-38, %v1129_v21  ;;  %vm1128_vm15 = vcmp.eq.f32.partialorder %v1127_v58, 8.507059e+37 }
 0xcb0   : > { %v1536_v52 = vpop.eup %1535 }
 0xcb1   : > { %v1119_v54 = vmul.f32 %v1536_v52, %v1117_v48  ;;  %vm1124_vm9 = vweird.f32 %v1536_v52 }
 0xcb2   : > { %vm1125_vm12 = vmor %vm1123_vm11, %vm1124_vm9 }
 0xcb3   : > { %v1120_v56 = vsub.f32 1.0, %v1119_v54  ;;  %v1474_v54 = vld [vmem:[%s1969_s12 + $0x70] sm:$0xff] }
 0xcb5   : > { %v1121_v57 = vmul.f32 %v1536_v52, %v1120_v56  ;;  %v1472_v56 = vld [vmem:[%s1969_s12 + $0x60] sm:$0xff] }
 0xcb7   : > { %v1122_v60 = vadd.f32 %v1536_v52, %v1121_v57  ;;  %v1471_v57 = vld [vmem:[%s1969_s12 + $0x58] sm:$0xff] }
 0xcb9   : > { %v1126_v1 = vsel %vm1125_vm12, %v1536_v52, %v1122_v60  ;;  %v1475_v52 = vld [vmem:[%s1969_s12 + $0x78] sm:$0xff] }
 0xcba   : > { %v1131_v2 = vsel %vm1128_vm15, %v1130_v63, %v1126_v1  ;;  %1343 = vmatpush.msrb.mxu0 %v1475_v52  ;;  %v1469_v63 = vld [vmem:[%s1969_s12 + $0x48] sm:$0xff] }
 0xcbb   : > { %v1132_v4 = vmul.f32 %v1532_v43, %v1131_v2  ;;  %v1468_v2 = vld [vmem:[%s1969_s12 + $0x40] sm:$0xff] }
 0xcbc   : > { %1344 = vmatpush.msrb.mxu0 %v1474_v54 }
 0xcbd   : > { %1454 = vmatmul.msk.f32.vlgmr.msrb.gmra.mxu1 %vm631_vm14, %v1132_v4 }
 0xcbe   : > { %1345 = vmatpush.msrb.mxu0 %v1473_v55 }
 0xcc0   : > { %1346 = vmatpush.msrb.mxu0 %v1472_v56 }
 0xcc1   : > { %v1051_v6 = vpop.permute.xlu1 %1050 }
 0xcc2   : > { %1447 = vmatpush.msk.msra.mxu3 %vm635_vm7, %v1051_v6  ;;  %1347 = vmatpush.msrb.mxu0 %v1471_v57 }
 0xcc3   : > { %1448 = vmatmul.msk.f32.vlgmr.msra.gmra.mxu3 %vm631_vm14, %v1049_v7 }
 0xcc4   : > { %1203 = vmatpush.msrb.mxu3 %v1450_v9  ;;  %1348 = vmatpush.msrb.mxu0 %v1470_v59 }
 0xcc6   : > { %1204 = vmatpush.msrb.mxu3 %v1449_v10  ;;  %1349 = vmatpush.msrb.mxu0 %v1469_v63 }
 0xcc8   : > { %1350 = vmatpush.msrb.mxu0 %v1468_v2 }
 0xd3a   : > { %v1157_v11 = vpop.f32.mrf.mxu1 }
 0xd3b   : > { %1457 = vmatmul.msk.f32.vlgmr.msra.gmra.mxu1 %vm578_vm8, %v1157_v11 }
 0xd46   : > { %v1074_v12 = vpop.f32.mrf.mxu3 }
 0xd47   : > { %1458 = vmatmul.msk.f32.vlgmr.msrb.gmra.mxu3 %vm578_vm8, %v1074_v12 }
 0xdb8   : > { %v1183_v13 = vpop.f32.mrf.mxu1 }
 0xdca   : > { %v1206_v14 = vpop.f32.mrf.mxu3 }
 0xdcb   : > { %v1207_v15 = vadd.f32 %v1206_v14, %v1183_v13 }
 0xdcd   : > { %v1209_v17 = vadd.f32 %v1207_v15, %v1827_v61  ;;  %v1464_v61 = vld [vmem:[%s1967_s10 + $0x30] sm:$0xff] }
 0xdce   : > { %1276 = vmatpush.msrb.mxu2 %v1464_v61 }
 0xdcf   : > { %v1889_v18 = vadd.f32 %v1504_v16, %v1209_v17 }
 0xdd0   : > { %1277 = vmatpush.msrb.mxu2 %v1463_v27  ;;  %v1508_v27 = vld [vmem:[%s1970_s13 + $0x1] ss:$0 sm:$0xff] }
 0xdd1   : > { %v1220_v19 = vsel %vm464_vm0, %v1889_v18, 0.0 }
 0xdd2   : > { %1221 = vadd.xlane.f32.xlu1 %v1220_v19  ;;  %1278 = vmatpush.msrb.mxu2 %v1462_v28 }
 0xe45   : > { %v1222_v20 = vpop.xlane.xlu1 %1221 }
 0xe46   : > { %v1223_v22 = vmul.f32 %v1222_v20, %v1707_v29 }
 0xe48   : > { %v1224_v23 = vsub.f32 %v1889_v18, %v1223_v22 }
 0xe4a   : > { %v1225_v24 = vmul.f32 %v1224_v23, %v1224_v23 }
 0xe4c   : > { %v1226_v25 = vsel %vm464_vm0, %v1225_v24, 0.0 }
 0xe4d   : > { %1227 = vadd.xlane.f32.xlu2 %v1226_v25 }
 0xec0   : > { %v1228_v30 = vpop.xlane.xlu2 %1227 }
 0xec1   : > { %v1229_v31 = vmul.f32 %v1228_v30, %v1707_v29  ;;  %v1506_v29 = vld [vmem:[%s1966_s9 + $0x1] ss:$0 sm:$0xff] }
 0xec3   : > { %v1230_v32 = vadd.f32 1e-05, %v1229_v31 }
 0xec5   : > { %1537 = vrsqrt.f32 %v1230_v32  ;;  %vm1237_vm8 = vweird.f32 %v1230_v32 }
 0xecb   : > { %v1538_v33 = vpop.eup %1537 }
 0xecc   : > { %v1232_v34 = vmul.f32 %v1538_v33, %v1230_v32  ;;  %vm1238_vm7 = vweird.f32 %v1538_v33 }
 0xecd   : > { %vm1239_vm14 = vmor %vm1237_vm8, %vm1238_vm7 }
 0xece   : > { %v1233_v35 = vmul.f32 %v1538_v33, %v1232_v34 }
 0xed0   : > { %v1234_v36 = vmul.f32 0.5, %v1233_v35 }
 0xed2   : > { %v1235_v37 = vsub.f32 1.5, %v1234_v36 }
 0xed4   : > { %v1236_v38 = vmul.f32 %v1538_v33, %v1235_v37 }
 0xed6   : > { %v1240_v40 = vsel %vm1239_vm14, %v1538_v33, %v1236_v38 }
 0xed7   : > { %v1241_v41 = vmul.f32 %v1240_v40, %v1224_v23 }
 0xed9   : > { %v1245_v42 = vmul.f32 %v1505_v39, %v1241_v41 }
 0xedb   : > { %v1249_v43 = vadd.f32 %v1506_v29, %v1245_v42 }
 0xedd   : > { %1467 = vmatmul.msk.f32.vlgmr.msrb.gmra.mxu2 %vm551_vm6, %v1249_v43 }
 0xf60   : > { %v1280_v45 = vpop.f32.mrf.mxu2 }
 0xf61   : > { %v1281_v46 = vadd.f32 %v1507_v44, %v1280_v45 }
 0xf63   : > { %v1284_v47 = vmul.f32 0.70710677, %v1281_v46  ;;  %v1283_v25 = vmul.f32 0.5, %v1281_v46 }
 0xf65   : > { %v1287_v48 = vand.u32 2147483647, %v1284_v47  ;;  %vm1285_vm10 = vcmp.ge.f32.partialorder %v1284_v47, 0.0 }
 0xf66   : > { %v1286_v23 = vsel %vm1285_vm10, 1.0, %v1557_v53 }
 0xf67   : > { %v1288_v50 = vmul.f32 0.3275911, %v1287_v48  ;;  %v1314_v6 = vsub.f32 0.0, %v1287_v48 }
 0xf69   : > { %v1289_v51 = vadd.f32 1.0, %v1288_v50  ;;  %v1315_v9 = vmul.f32 %v1314_v6, %v1287_v48 }
 0xf6b   : > { %1539 = vrcp.f32 %v1289_v51  ;;  %v1301_v62 = vand.u32 2147483648, %v1289_v51  ;;  %v1299_v1 = vand.u32 2147483647, %v1289_v51  ;;  %vm1295_vm4 = vweird.f32 %v1289_v51 }
 0xf6c   : > { %v1316_v12 = vmul.f32 1.442695, %v1315_v9 }
 0xf6d   : > { %v1302_v4 = vor.u32 1.1754944e-38, %v1301_v62  ;;  %vm1300_vm9 = vcmp.eq.f32.partialorder %v1299_v1, 8.507059e+37 }
 0xf6e   : > { %1541 = vpow2.f32 %v1316_v12 }
 0xf71   : > { %v1540_v21 = vpop.eup %1539 }
 0xf72   : > { %v1291_v58 = vmul.f32 %v1540_v21, %v1289_v51  ;;  %vm1296_vm6 = vweird.f32 %v1540_v21 }
 0xf73   : > { %vm1297_vm5 = vmor %vm1295_vm4, %vm1296_vm6 }
 0xf74   : > { %v1292_v60 = vsub.f32 1.0, %v1291_v58  ;;  %v1542_v19 = vpop.eup %1541 }
 0xf76   : > { %v1293_v0 = vmul.f32 %v1540_v21, %v1292_v60 }
 0xf78   : > { %v1294_v3 = vadd.f32 %v1540_v21, %v1293_v0 }
 0xf7a   : > { %v1298_v49 = vsel %vm1297_vm5, %v1540_v21, %v1294_v3 }
 0xf7b   : > { %v1303_v5 = vsel %vm1300_vm9, %v1302_v4, %v1298_v49 }
 0xf7c   : > { %v1305_v7 = vmul.f32 1.0614054, %v1303_v5 }
 0xf7e   : > { %v1306_v8 = vadd.f32 -1.4531521, %v1305_v7 }
 0xf80   : > { %v1307_v10 = vmul.f32 %v1306_v8, %v1303_v5 }
 0xf82   : > { %v1308_v11 = vadd.f32 1.4214138, %v1307_v10 }
 0xf84   : > { %v1309_v13 = vmul.f32 %v1308_v11, %v1303_v5 }
 0xf86   : > { %v1310_v14 = vadd.f32 -0.28449672, %v1309_v13 }
 0xf88   : > { %v1311_v15 = vmul.f32 %v1310_v14, %v1303_v5 }
 0xf8a   : > { %v1312_v16 = vadd.f32 0.2548296, %v1311_v15 }
 0xf8c   : > { %v1313_v17 = vmul.f32 %v1312_v16, %v1303_v5 }
 0xf8e   : > { %v1318_v20 = vmul.f32 %v1542_v19, %v1313_v17 }
 0xf90   : > { %v1319_v22 = vsub.f32 1.0, %v1318_v20 }
 0xf92   : > { %v1320_v24 = vmul.f32 %v1319_v22, %v1286_v23 }
 0xf94   : > { %v1321_v26 = vadd.f32 1.0, %v1320_v24 }
 0xf96   : > { %v1322_v61 = vmul.f32 %v1321_v26, %v1283_v25 }
 0xf98   : > { %1476 = vmatmul.msk.f32.vlgmr.msrb.gmra.mxu0 %vm906_vm2, %v1322_v61 }
0x1015   : > { %v1352_v28 = vpop.f32.mrf.mxu0 }
0x1016   : > { %v1355_v30 = vadd.f32 %v1352_v28, %v1889_v18 }
0x1018   : > { %v1361_v31 = vadd.f32 %v1508_v27, %v1355_v30 }
0x101a   : > { %1362 = vst.msk [vmem:[%s462_s26] sm:$0x1f] %vm464_vm0, %v1361_v31 }
0x101b PF: > { %s24_s29 = sadd.s32 1, %s1549_s29  }
0x101c   : > { %p21_p4 = scmp.ge.s32.totalorder %s24_s29, 4  }
0x101e   :  { %23 = sbr.rel (!%p21_p4) target bundleno = 1 (0x1), region = 119 }

</bundles_post_ra>
